<compile_context>
chip_gen: v6e
topology: v6e:2x2x1
jax: 0.10.0
libtpu: 0.0.40
codegen_flags: <defaults>
</compile_context>

<pallas_src>
import functools

import jax
import jax.numpy as jnp
from jax.experimental import pallas as pl
from jax.experimental.pallas import tpu as pltpu


# ---------------------------------------------------------------------------
# Per-scale selection / validity weights, built ONCE in the wrapper.
#   weights[s]              : 1.0 where (i % 2**s == 0) & (j % 2**s == 0)
#   weights[scales + s]     : selector & (j + 2**s < W)   (x-gradient weight)
#   weights[2*scales + s]   : selector & (i + 2**s < H)   (y-gradient weight)
# ---------------------------------------------------------------------------
def _make_scale_weights(H, W, scales):
    r = jnp.arange(H, dtype=jnp.int32)[:, None]
    c = jnp.arange(W, dtype=jnp.int32)[None, :]
    sels, wxs, wys = [], [], []
    for s in range(scales):
        step = 1 << s
        sel = (r % step == 0) & (c % step == 0)
        sels.append(sel)
        wxs.append(sel & (c + step < W))
        wys.append(sel & (r + step < H))
    return jnp.stack(sels + wxs + wys).astype(jnp.float32)


# ---------------------------------------------------------------------------
# Kernel: one (Bt, H, W) batch tile per grid step.  All scales fused; per-scale
# (loss, mask) contributions accumulate elementwise into VMEM scratch; the
# cross-lane reduction + SMEM scalar stores run only at the last grid step.
#
# For scale s (step = 2**s) the per-image contribution is
#   sum |d(i,j) - d(i,j+step)| * m(i,j) * m(i,j+step)  over on-grid (i,j), j+step<W
# + sum |d(i,j) - d(i+step,j)| * m(i,j) * m(i+step,j)  over on-grid (i,j), i+step<H
# with d = mask * (pred - target), which equals the PyTorch
# gradient_loss(pred[:, ::step, ::step], ...) image_loss term exactly.
# ---------------------------------------------------------------------------
def _grad_loss_kernel(w_ref, pred_ref, targ_ref, mask_ref, loss_ref, msum_ref,
                      acc_ref, macc_ref, *, scales):
    b = pl.program_id(0)
    bt, H, W = pred_ref.shape

    @pl.when(b == 0)
    def _init():
        acc_ref[...] = jnp.zeros_like(acc_ref)
        macc_ref[...] = jnp.zeros_like(macc_ref)

    # Hoisted weight loads (resident block), reused for every image of the step.
    wxs = [w_ref[scales + s] for s in range(scales)]
    wys = [w_ref[2 * scales + s] for s in range(scales)]

    for i in range(bt):
        pred = pred_ref[i]
        targ = targ_ref[i]
        mask = mask_ref[i]
        diff = mask * (pred - targ)

        macc_ref[...] += mask

        for s in range(scales):
            step = 1 << s
            # Shifted views via XLU rotations (no retiled VMEM slice copies).
            # Wrapped rows/columns are zeroed by the precomputed weights.
            d_x = pltpu.roll(diff, (-step) % W, 1)
            m_x = pltpu.roll(mask, (-step) % W, 1)
            d_y = pltpu.roll(diff, (-step) % H, 0)
            m_y = pltpu.roll(mask, (-step) % H, 0)
            gx = jnp.abs(diff - d_x) * (mask * wxs[s]) * m_x
            gy = jnp.abs(diff - d_y) * (mask * wys[s]) * m_y
            acc_ref[s] += gx + gy

    @pl.when(b == pl.num_programs(0) - 1)
    def _finalize():
        macc = macc_ref[...]
        for s in range(scales):
            loss_ref[s] = jnp.sum(acc_ref[s])
            msum_ref[s] = jnp.sum(macc * w_ref[s])


def _pick_block_batch(B, H, W, budget_bytes=8 << 20, cap=8):
    """Largest divisor of B (<= cap) whose double-buffered inputs fit budget."""
    per_img = 3 * H * W * 4 * 2          # 3 f32 inputs, double-buffered
    bt = max(1, min(B, cap, budget_bytes // max(per_img, 1)))
    while bt > 1 and B % bt:
        bt -= 1
    return int(bt)


def _gradient_loss_sums(prediction, target, mask, scales):
    """Returns (per-scale loss sums, per-scale mask sums), each shape [scales]."""
    B, H, W = prediction.shape
    bt = _pick_block_batch(B, H, W)
    weights = _make_scale_weights(H, W, scales)

    kernel = functools.partial(_grad_loss_kernel, scales=scales)

    # VMEM budget: double-buffered inputs + resident weights + scratch, with
    # headroom; capped so the limit stays valid on v7x (64 MiB physical VMEM).
    vmem_needed = (3 * bt * H * W * 4 * 2
                   + 3 * scales * H * W * 4 * 2
                   + (scales + 1) * H * W * 4)
    vmem_limit = int(min(max(2 * vmem_needed, 16 << 20), 64 << 20))

    flops = int(B * H * W * (4 + 16 * scales) + 2 * scales * H * W)
    bytes_accessed = int((3 * B + 3 * scales) * H * W * 4 + 2 * scales * 4)

    loss_sums, mask_sums = pl.pallas_call(
        kernel,
        grid=(B // bt,),
        in_specs=[
            # Constant block index -> weights stay resident across the grid.
            pl.BlockSpec((3 * scales, H, W), lambda b: (0, 0, 0)),
            pl.BlockSpec((bt, H, W), lambda b: (b, 0, 0)),
            pl.BlockSpec((bt, H, W), lambda b: (b, 0, 0)),
            pl.BlockSpec((bt, H, W), lambda b: (b, 0, 0)),
        ],
        out_specs=(
            pl.BlockSpec(memory_space=pltpu.MemorySpace.SMEM),
            pl.BlockSpec(memory_space=pltpu.MemorySpace.SMEM),
        ),
        out_shape=(
            jax.ShapeDtypeStruct((scales,), jnp.float32),
            jax.ShapeDtypeStruct((scales,), jnp.float32),
        ),
        scratch_shapes=[
            pltpu.VMEM((scales, H, W), jnp.float32),   # per-scale loss partials
            pltpu.VMEM((H, W), jnp.float32),           # batch-summed mask
        ],
        compiler_params=pltpu.CompilerParams(
            # Batch axis accumulates into resident VMEM scratch -> arbitrary.
            dimension_semantics=("arbitrary",),
            vmem_limit_bytes=vmem_limit,
        ),
        cost_estimate=pl.CostEstimate(
            flops=flops, transcendentals=0, bytes_accessed=bytes_accessed),
    )(weights, prediction, target, mask)
    return loss_sums, mask_sums


class GradientLoss:
    """JAX/Pallas port of the PyTorch GradientLoss (batch-based reduction)."""

    # TODO(synk): 'image-based' reduction (per-image normalize + mean) not
    # wired; the module default is 'batch-based', which is what we implement.
    def __init__(self, scales=4, reduction="batch-based"):
        assert reduction == "batch-based"
        self._scales = scales

    def __call__(self, prediction, target, mask):
        loss_sums, mask_sums = _gradient_loss_sums(
            prediction, target, mask, self._scales)
        # reduction_batch_based per scale: sum(image_loss) / sum(M), 0 if sum(M)==0
        safe = jnp.where(mask_sums == 0.0, 1.0, mask_sums)
        per_scale = jnp.where(mask_sums == 0.0, 0.0, loss_sums / safe)
        return jnp.sum(per_scale)


def _reference(prediction, target, mask, scales=4):
    """Pure-JAX reference (direct transcription of the PyTorch code)."""
    def one(p, t, m):
        diff = m * (p - t)
        gx = jnp.abs(diff[:, :, 1:] - diff[:, :, :-1]) * (m[:, :, 1:] * m[:, :, :-1])
        gy = jnp.abs(diff[:, 1:, :] - diff[:, :-1, :]) * (m[:, 1:, :] * m[:, :-1, :])
        img = jnp.sum(gx, (1, 2)) + jnp.sum(gy, (1, 2))
        div = jnp.sum(jnp.sum(m, (1, 2)))
        return jnp.where(div == 0.0, 0.0,
                         jnp.sum(img) / jnp.where(div == 0.0, 1.0, div))

    total = 0.0
    for s in range(scales):
        st = 2 ** s
        total = total + one(prediction[:, ::st, ::st], target[:, ::st, ::st],
                            mask[:, ::st, ::st])
    return total


if __name__ == "__main__":
    key = jax.random.PRNGKey(0)
    k1, k2, k3 = jax.random.split(key, 3)

    B, H, W = 2, 32, 128
    prediction = jax.random.normal(k1, (B, H, W), dtype=jnp.float32)
    target = jax.random.normal(k2, (B, H, W), dtype=jnp.float32)
    mask = (jax.random.uniform(k3, (B, H, W)) > 0.3).astype(jnp.float32)

    loss_fn = GradientLoss(scales=4, reduction="batch-based")
    out = jax.block_until_ready(loss_fn(prediction, target, mask))

    ref = jax.block_until_ready(_reference(prediction, target, mask, scales=4))
    assert jnp.allclose(out, ref, rtol=1e-4, atol=1e-4), (out, ref)

    print("KERNEL_OK")
</pallas_src>

<mosaic_0001>
module attributes {stable_mosaic.version = 11 : i64} {
  func.func @_grad_loss_kernel(%arg0: i32, %arg1: memref<12x32x128xf32, #tpu.memory_space<vmem>>, %arg2: memref<2x32x128xf32, #tpu.memory_space<vmem>>, %arg3: memref<2x32x128xf32, #tpu.memory_space<vmem>>, %arg4: memref<2x32x128xf32, #tpu.memory_space<vmem>>, %arg5: memref<4xf32, #tpu.memory_space<smem>>, %arg6: memref<4xf32, #tpu.memory_space<smem>>, %arg7: memref<4x32x128xf32, #tpu.memory_space<vmem>>, %arg8: memref<32x128xf32, #tpu.memory_space<vmem>>) attributes {dimension_semantics = [#tpu.dimension_semantics<arbitrary>], iteration_bounds = array<i64: 1>, scalar_prefetch = 0 : i64, scratch_operands = 2 : i64, tpu.core_type = #tpu.core_type<tc>, window_params = [{pipeline_mode = #tpu.pipeline_mode<synchronous>, transform_indices = @transform_0, window_bounds = array<i64: 12, 32, 128>}, {transform_indices = @transform_1, window_bounds = array<i64: 2, 32, 128>}, {transform_indices = @transform_2, window_bounds = array<i64: 2, 32, 128>}, {transform_indices = @transform_3, window_bounds = array<i64: 2, 32, 128>}, {transform_indices = @transform_4, window_bounds = array<i64: 4>}, {transform_indices = @transform_5, window_bounds = array<i64: 4>}]} {
    %c0_i32 = arith.constant 0 : i32
    %0 = arith.cmpi eq, %arg0, %c0_i32 : i32
    %1 = arith.extui %0 : i1 to i32
    %c0_i32_0 = arith.constant 0 : i32
    %2 = arith.cmpi ne, %1, %c0_i32_0 : i32
    scf.if %2 {
      %cst = arith.constant 0.000000e+00 : f32
      %212 = vector.broadcast %cst : f32 to vector<4x32x128xf32>
      %c0_113 = arith.constant 0 : index
      %c0_114 = arith.constant 0 : index
      %c0_115 = arith.constant 0 : index
      %213 = vector.load %arg7[%c0_113, %c0_114, %c0_115] : memref<4x32x128xf32, #tpu.memory_space<vmem>>, vector<4x32x128xf32>
      tpu.vector_store %arg7[%c0_113, %c0_114, %c0_115], %212 {strides = array<i32>} : memref<4x32x128xf32, #tpu.memory_space<vmem>>, vector<4x32x128xf32>,
      %cst_116 = arith.constant 0.000000e+00 : f32
      %214 = vector.broadcast %cst_116 : f32 to vector<32x128xf32>
      %c0_117 = arith.constant 0 : index
      %c0_118 = arith.constant 0 : index
      %215 = vector.load %arg8[%c0_117, %c0_118] : memref<32x128xf32, #tpu.memory_space<vmem>>, vector<32x128xf32>
      tpu.vector_store %arg8[%c0_117, %c0_118], %214 {strides = array<i32>} : memref<32x128xf32, #tpu.memory_space<vmem>>, vector<32x128xf32>,
    } else {
    }
    %c4 = arith.constant 4 : index
    %c0 = arith.constant 0 : index
    %c0_1 = arith.constant 0 : index
    %3 = vector.load %arg1[%c4, %c0, %c0_1] : memref<12x32x128xf32, #tpu.memory_space<vmem>>, vector<1x32x128xf32>
    %4 = vector.shape_cast %3 : vector<1x32x128xf32> to vector<32x128xf32>
    %c5 = arith.constant 5 : index
    %c0_2 = arith.constant 0 : index
    %c0_3 = arith.constant 0 : index
    %5 = vector.load %arg1[%c5, %c0_2, %c0_3] : memref<12x32x128xf32, #tpu.memory_space<vmem>>, vector<1x32x128xf32>
    %6 = vector.shape_cast %5 : vector<1x32x128xf32> to vector<32x128xf32>
    %c6 = arith.constant 6 : index
    %c0_4 = arith.constant 0 : index
    %c0_5 = arith.constant 0 : index
    %7 = vector.load %arg1[%c6, %c0_4, %c0_5] : memref<12x32x128xf32, #tpu.memory_space<vmem>>, vector<1x32x128xf32>
    %8 = vector.shape_cast %7 : vector<1x32x128xf32> to vector<32x128xf32>
    %c7 = arith.constant 7 : index
    %c0_6 = arith.constant 0 : index
    %c0_7 = arith.constant 0 : index
    %9 = vector.load %arg1[%c7, %c0_6, %c0_7] : memref<12x32x128xf32, #tpu.memory_space<vmem>>, vector<1x32x128xf32>
    %10 = vector.shape_cast %9 : vector<1x32x128xf32> to vector<32x128xf32>
    %c8 = arith.constant 8 : index
    %c0_8 = arith.constant 0 : index
    %c0_9 = arith.constant 0 : index
    %11 = vector.load %arg1[%c8, %c0_8, %c0_9] : memref<12x32x128xf32, #tpu.memory_space<vmem>>, vector<1x32x128xf32>
    %12 = vector.shape_cast %11 : vector<1x32x128xf32> to vector<32x128xf32>
    %c9 = arith.constant 9 : index
    %c0_10 = arith.constant 0 : index
    %c0_11 = arith.constant 0 : index
    %13 = vector.load %arg1[%c9, %c0_10, %c0_11] : memref<12x32x128xf32, #tpu.memory_space<vmem>>, vector<1x32x128xf32>
    %14 = vector.shape_cast %13 : vector<1x32x128xf32> to vector<32x128xf32>
    %c10 = arith.constant 10 : index
    %c0_12 = arith.constant 0 : index
    %c0_13 = arith.constant 0 : index
    %15 = vector.load %arg1[%c10, %c0_12, %c0_13] : memref<12x32x128xf32, #tpu.memory_space<vmem>>, vector<1x32x128xf32>
    %16 = vector.shape_cast %15 : vector<1x32x128xf32> to vector<32x128xf32>
    %c11 = arith.constant 11 : index
    %c0_14 = arith.constant 0 : index
    %c0_15 = arith.constant 0 : index
    %17 = vector.load %arg1[%c11, %c0_14, %c0_15] : memref<12x32x128xf32, #tpu.memory_space<vmem>>, vector<1x32x128xf32>
    %18 = vector.shape_cast %17 : vector<1x32x128xf32> to vector<32x128xf32>
    %c0_16 = arith.constant 0 : index
    %c0_17 = arith.constant 0 : index
    %c0_18 = arith.constant 0 : index
    %19 = vector.load %arg2[%c0_16, %c0_17, %c0_18] : memref<2x32x128xf32, #tpu.memory_space<vmem>>, vector<1x32x128xf32>
    %20 = vector.shape_cast %19 : vector<1x32x128xf32> to vector<32x128xf32>
    %c0_19 = arith.constant 0 : index
    %c0_20 = arith.constant 0 : index
    %c0_21 = arith.constant 0 : index
    %21 = vector.load %arg3[%c0_19, %c0_20, %c0_21] : memref<2x32x128xf32, #tpu.memory_space<vmem>>, vector<1x32x128xf32>
    %22 = vector.shape_cast %21 : vector<1x32x128xf32> to vector<32x128xf32>
    %c0_22 = arith.constant 0 : index
    %c0_23 = arith.constant 0 : index
    %c0_24 = arith.constant 0 : index
    %23 = vector.load %arg4[%c0_22, %c0_23, %c0_24] : memref<2x32x128xf32, #tpu.memory_space<vmem>>, vector<1x32x128xf32>
    %24 = vector.shape_cast %23 : vector<1x32x128xf32> to vector<32x128xf32>
    %25 = arith.subf %20, %22 : vector<32x128xf32>
    %26 = arith.mulf %24, %25 : vector<32x128xf32>
    %c0_25 = arith.constant 0 : index
    %c0_26 = arith.constant 0 : index
    %27 = vector.load %arg8[%c0_25, %c0_26] : memref<32x128xf32, #tpu.memory_space<vmem>>, vector<32x128xf32>
    %28 = arith.addf %27, %24 : vector<32x128xf32>
    %c0_27 = arith.constant 0 : index
    %c0_28 = arith.constant 0 : index
    %29 = vector.load %arg8[%c0_27, %c0_28] : memref<32x128xf32, #tpu.memory_space<vmem>>, vector<32x128xf32>
    tpu.vector_store %arg8[%c0_27, %c0_28], %28 {strides = array<i32>} : memref<32x128xf32, #tpu.memory_space<vmem>>, vector<32x128xf32>,
    %c127_i32 = arith.constant 127 : i32
    %30 = tpu.dynamic_rotate %26 by %c127_i32 dim 1 : vector<32x128xf32>, i32 -> vector<32x128xf32>
    %c127_i32_29 = arith.constant 127 : i32
    %31 = tpu.dynamic_rotate %24 by %c127_i32_29 dim 1 : vector<32x128xf32>, i32 -> vector<32x128xf32>
    %c31_i32 = arith.constant 31 : i32
    %32 = tpu.dynamic_rotate %26 by %c31_i32 dim 0 : vector<32x128xf32>, i32 -> vector<32x128xf32>
    %c31_i32_30 = arith.constant 31 : i32
    %33 = tpu.dynamic_rotate %24 by %c31_i32_30 dim 0 : vector<32x128xf32>, i32 -> vector<32x128xf32>
    %34 = arith.subf %26, %30 : vector<32x128xf32>
    %35 = math.absf %34 : vector<32x128xf32>
    %36 = arith.mulf %24, %4 : vector<32x128xf32>
    %37 = arith.mulf %35, %36 : vector<32x128xf32>
    %38 = arith.mulf %37, %31 : vector<32x128xf32>
    %39 = arith.subf %26, %32 : vector<32x128xf32>
    %40 = math.absf %39 : vector<32x128xf32>
    %41 = arith.mulf %24, %12 : vector<32x128xf32>
    %42 = arith.mulf %40, %41 : vector<32x128xf32>
    %43 = arith.mulf %42, %33 : vector<32x128xf32>
    %c0_31 = arith.constant 0 : index
    %c0_32 = arith.constant 0 : index
    %c0_33 = arith.constant 0 : index
    %44 = vector.load %arg7[%c0_31, %c0_32, %c0_33] : memref<4x32x128xf32, #tpu.memory_space<vmem>>, vector<1x32x128xf32>
    %45 = vector.shape_cast %44 : vector<1x32x128xf32> to vector<32x128xf32>
    %46 = arith.addf %38, %43 : vector<32x128xf32>
    %47 = arith.addf %45, %46 : vector<32x128xf32>
    %c0_34 = arith.constant 0 : index
    %c0_35 = arith.constant 0 : index
    %c0_36 = arith.constant 0 : index
    %48 = vector.load %arg7[%c0_34, %c0_35, %c0_36] : memref<4x32x128xf32, #tpu.memory_space<vmem>>, vector<1x32x128xf32>
    %49 = vector.shape_cast %48 : vector<1x32x128xf32> to vector<32x128xf32>
    %50 = vector.shape_cast %47 : vector<32x128xf32> to vector<1x32x128xf32>
    tpu.vector_store %arg7[%c0_34, %c0_35, %c0_36], %50 {strides = array<i32>} : memref<4x32x128xf32, #tpu.memory_space<vmem>>, vector<1x32x128xf32>,
    %c126_i32 = arith.constant 126 : i32
    %51 = tpu.dynamic_rotate %26 by %c126_i32 dim 1 : vector<32x128xf32>, i32 -> vector<32x128xf32>
    %c126_i32_37 = arith.constant 126 : i32
    %52 = tpu.dynamic_rotate %24 by %c126_i32_37 dim 1 : vector<32x128xf32>, i32 -> vector<32x128xf32>
    %c30_i32 = arith.constant 30 : i32
    %53 = tpu.dynamic_rotate %26 by %c30_i32 dim 0 : vector<32x128xf32>, i32 -> vector<32x128xf32>
    %c30_i32_38 = arith.constant 30 : i32
    %54 = tpu.dynamic_rotate %24 by %c30_i32_38 dim 0 : vector<32x128xf32>, i32 -> vector<32x128xf32>
    %55 = arith.subf %26, %51 : vector<32x128xf32>
    %56 = math.absf %55 : vector<32x128xf32>
    %57 = arith.mulf %24, %6 : vector<32x128xf32>
    %58 = arith.mulf %56, %57 : vector<32x128xf32>
    %59 = arith.mulf %58, %52 : vector<32x128xf32>
    %60 = arith.subf %26, %53 : vector<32x128xf32>
    %61 = math.absf %60 : vector<32x128xf32>
    %62 = arith.mulf %24, %14 : vector<32x128xf32>
    %63 = arith.mulf %61, %62 : vector<32x128xf32>
    %64 = arith.mulf %63, %54 : vector<32x128xf32>
    %c1 = arith.constant 1 : index
    %c0_39 = arith.constant 0 : index
    %c0_40 = arith.constant 0 : index
    %65 = vector.load %arg7[%c1, %c0_39, %c0_40] : memref<4x32x128xf32, #tpu.memory_space<vmem>>, vector<1x32x128xf32>
    %66 = vector.shape_cast %65 : vector<1x32x128xf32> to vector<32x128xf32>
    %67 = arith.addf %59, %64 : vector<32x128xf32>
    %68 = arith.addf %66, %67 : vector<32x128xf32>
    %c1_41 = arith.constant 1 : index
    %c0_42 = arith.constant 0 : index
    %c0_43 = arith.constant 0 : index
    %69 = vector.load %arg7[%c1_41, %c0_42, %c0_43] : memref<4x32x128xf32, #tpu.memory_space<vmem>>, vector<1x32x128xf32>
    %70 = vector.shape_cast %69 : vector<1x32x128xf32> to vector<32x128xf32>
    %71 = vector.shape_cast %68 : vector<32x128xf32> to vector<1x32x128xf32>
    tpu.vector_store %arg7[%c1_41, %c0_42, %c0_43], %71 {strides = array<i32>} : memref<4x32x128xf32, #tpu.memory_space<vmem>>, vector<1x32x128xf32>,
    %c124_i32 = arith.constant 124 : i32
    %72 = tpu.dynamic_rotate %26 by %c124_i32 dim 1 : vector<32x128xf32>, i32 -> vector<32x128xf32>
    %c124_i32_44 = arith.constant 124 : i32
    %73 = tpu.dynamic_rotate %24 by %c124_i32_44 dim 1 : vector<32x128xf32>, i32 -> vector<32x128xf32>
    %c28_i32 = arith.constant 28 : i32
    %74 = tpu.dynamic_rotate %26 by %c28_i32 dim 0 : vector<32x128xf32>, i32 -> vector<32x128xf32>
    %c28_i32_45 = arith.constant 28 : i32
    %75 = tpu.dynamic_rotate %24 by %c28_i32_45 dim 0 : vector<32x128xf32>, i32 -> vector<32x128xf32>
    %76 = arith.subf %26, %72 : vector<32x128xf32>
    %77 = math.absf %76 : vector<32x128xf32>
    %78 = arith.mulf %24, %8 : vector<32x128xf32>
    %79 = arith.mulf %77, %78 : vector<32x128xf32>
    %80 = arith.mulf %79, %73 : vector<32x128xf32>
    %81 = arith.subf %26, %74 : vector<32x128xf32>
    %82 = math.absf %81 : vector<32x128xf32>
    %83 = arith.mulf %24, %16 : vector<32x128xf32>
    %84 = arith.mulf %82, %83 : vector<32x128xf32>
    %85 = arith.mulf %84, %75 : vector<32x128xf32>
    %c2 = arith.constant 2 : index
    %c0_46 = arith.constant 0 : index
    %c0_47 = arith.constant 0 : index
    %86 = vector.load %arg7[%c2, %c0_46, %c0_47] : memref<4x32x128xf32, #tpu.memory_space<vmem>>, vector<1x32x128xf32>
    %87 = vector.shape_cast %86 : vector<1x32x128xf32> to vector<32x128xf32>
    %88 = arith.addf %80, %85 : vector<32x128xf32>
    %89 = arith.addf %87, %88 : vector<32x128xf32>
    %c2_48 = arith.constant 2 : index
    %c0_49 = arith.constant 0 : index
    %c0_50 = arith.constant 0 : index
    %90 = vector.load %arg7[%c2_48, %c0_49, %c0_50] : memref<4x32x128xf32, #tpu.memory_space<vmem>>, vector<1x32x128xf32>
    %91 = vector.shape_cast %90 : vector<1x32x128xf32> to vector<32x128xf32>
    %92 = vector.shape_cast %89 : vector<32x128xf32> to vector<1x32x128xf32>
    tpu.vector_store %arg7[%c2_48, %c0_49, %c0_50], %92 {strides = array<i32>} : memref<4x32x128xf32, #tpu.memory_space<vmem>>, vector<1x32x128xf32>,
    %c120_i32 = arith.constant 120 : i32
    %93 = tpu.dynamic_rotate %26 by %c120_i32 dim 1 : vector<32x128xf32>, i32 -> vector<32x128xf32>
    %c120_i32_51 = arith.constant 120 : i32
    %94 = tpu.dynamic_rotate %24 by %c120_i32_51 dim 1 : vector<32x128xf32>, i32 -> vector<32x128xf32>
    %c24_i32 = arith.constant 24 : i32
    %95 = tpu.dynamic_rotate %26 by %c24_i32 dim 0 : vector<32x128xf32>, i32 -> vector<32x128xf32>
    %c24_i32_52 = arith.constant 24 : i32
    %96 = tpu.dynamic_rotate %24 by %c24_i32_52 dim 0 : vector<32x128xf32>, i32 -> vector<32x128xf32>
    %97 = arith.subf %26, %93 : vector<32x128xf32>
    %98 = math.absf %97 : vector<32x128xf32>
    %99 = arith.mulf %24, %10 : vector<32x128xf32>
    %100 = arith.mulf %98, %99 : vector<32x128xf32>
    %101 = arith.mulf %100, %94 : vector<32x128xf32>
    %102 = arith.subf %26, %95 : vector<32x128xf32>
    %103 = math.absf %102 : vector<32x128xf32>
    %104 = arith.mulf %24, %18 : vector<32x128xf32>
    %105 = arith.mulf %103, %104 : vector<32x128xf32>
    %106 = arith.mulf %105, %96 : vector<32x128xf32>
    %c3 = arith.constant 3 : index
    %c0_53 = arith.constant 0 : index
    %c0_54 = arith.constant 0 : index
    %107 = vector.load %arg7[%c3, %c0_53, %c0_54] : memref<4x32x128xf32, #tpu.memory_space<vmem>>, vector<1x32x128xf32>
    %108 = vector.shape_cast %107 : vector<1x32x128xf32> to vector<32x128xf32>
    %109 = arith.addf %101, %106 : vector<32x128xf32>
    %110 = arith.addf %108, %109 : vector<32x128xf32>
    %c3_55 = arith.constant 3 : index
    %c0_56 = arith.constant 0 : index
    %c0_57 = arith.constant 0 : index
    %111 = vector.load %arg7[%c3_55, %c0_56, %c0_57] : memref<4x32x128xf32, #tpu.memory_space<vmem>>, vector<1x32x128xf32>
    %112 = vector.shape_cast %111 : vector<1x32x128xf32> to vector<32x128xf32>
    %113 = vector.shape_cast %110 : vector<32x128xf32> to vector<1x32x128xf32>
    tpu.vector_store %arg7[%c3_55, %c0_56, %c0_57], %113 {strides = array<i32>} : memref<4x32x128xf32, #tpu.memory_space<vmem>>, vector<1x32x128xf32>,
    %c1_58 = arith.constant 1 : index
    %c0_59 = arith.constant 0 : index
    %c0_60 = arith.constant 0 : index
    %114 = vector.load %arg2[%c1_58, %c0_59, %c0_60] : memref<2x32x128xf32, #tpu.memory_space<vmem>>, vector<1x32x128xf32>
    %115 = vector.shape_cast %114 : vector<1x32x128xf32> to vector<32x128xf32>
    %c1_61 = arith.constant 1 : index
    %c0_62 = arith.constant 0 : index
    %c0_63 = arith.constant 0 : index
    %116 = vector.load %arg3[%c1_61, %c0_62, %c0_63] : memref<2x32x128xf32, #tpu.memory_space<vmem>>, vector<1x32x128xf32>
    %117 = vector.shape_cast %116 : vector<1x32x128xf32> to vector<32x128xf32>
    %c1_64 = arith.constant 1 : index
    %c0_65 = arith.constant 0 : index
    %c0_66 = arith.constant 0 : index
    %118 = vector.load %arg4[%c1_64, %c0_65, %c0_66] : memref<2x32x128xf32, #tpu.memory_space<vmem>>, vector<1x32x128xf32>
    %119 = vector.shape_cast %118 : vector<1x32x128xf32> to vector<32x128xf32>
    %120 = arith.subf %115, %117 : vector<32x128xf32>
    %121 = arith.mulf %119, %120 : vector<32x128xf32>
    %c0_67 = arith.constant 0 : index
    %c0_68 = arith.constant 0 : index
    %122 = vector.load %arg8[%c0_67, %c0_68] : memref<32x128xf32, #tpu.memory_space<vmem>>, vector<32x128xf32>
    %123 = arith.addf %122, %119 : vector<32x128xf32>
    %c0_69 = arith.constant 0 : index
    %c0_70 = arith.constant 0 : index
    %124 = vector.load %arg8[%c0_69, %c0_70] : memref<32x128xf32, #tpu.memory_space<vmem>>, vector<32x128xf32>
    tpu.vector_store %arg8[%c0_69, %c0_70], %123 {strides = array<i32>} : memref<32x128xf32, #tpu.memory_space<vmem>>, vector<32x128xf32>,
    %c127_i32_71 = arith.constant 127 : i32
    %125 = tpu.dynamic_rotate %121 by %c127_i32_71 dim 1 : vector<32x128xf32>, i32 -> vector<32x128xf32>
    %c127_i32_72 = arith.constant 127 : i32
    %126 = tpu.dynamic_rotate %119 by %c127_i32_72 dim 1 : vector<32x128xf32>, i32 -> vector<32x128xf32>
    %c31_i32_73 = arith.constant 31 : i32
    %127 = tpu.dynamic_rotate %121 by %c31_i32_73 dim 0 : vector<32x128xf32>, i32 -> vector<32x128xf32>
    %c31_i32_74 = arith.constant 31 : i32
    %128 = tpu.dynamic_rotate %119 by %c31_i32_74 dim 0 : vector<32x128xf32>, i32 -> vector<32x128xf32>
    %129 = arith.subf %121, %125 : vector<32x128xf32>
    %130 = math.absf %129 : vector<32x128xf32>
    %131 = arith.mulf %119, %4 : vector<32x128xf32>
    %132 = arith.mulf %130, %131 : vector<32x128xf32>
    %133 = arith.mulf %132, %126 : vector<32x128xf32>
    %134 = arith.subf %121, %127 : vector<32x128xf32>
    %135 = math.absf %134 : vector<32x128xf32>
    %136 = arith.mulf %119, %12 : vector<32x128xf32>
    %137 = arith.mulf %135, %136 : vector<32x128xf32>
    %138 = arith.mulf %137, %128 : vector<32x128xf32>
    %c0_75 = arith.constant 0 : index
    %c0_76 = arith.constant 0 : index
    %c0_77 = arith.constant 0 : index
    %139 = vector.load %arg7[%c0_75, %c0_76, %c0_77] : memref<4x32x128xf32, #tpu.memory_space<vmem>>, vector<1x32x128xf32>
    %140 = vector.shape_cast %139 : vector<1x32x128xf32> to vector<32x128xf32>
    %141 = arith.addf %133, %138 : vector<32x128xf32>
    %142 = arith.addf %140, %141 : vector<32x128xf32>
    %c0_78 = arith.constant 0 : index
    %c0_79 = arith.constant 0 : index
    %c0_80 = arith.constant 0 : index
    %143 = vector.load %arg7[%c0_78, %c0_79, %c0_80] : memref<4x32x128xf32, #tpu.memory_space<vmem>>, vector<1x32x128xf32>
    %144 = vector.shape_cast %143 : vector<1x32x128xf32> to vector<32x128xf32>
    %145 = vector.shape_cast %142 : vector<32x128xf32> to vector<1x32x128xf32>
    tpu.vector_store %arg7[%c0_78, %c0_79, %c0_80], %145 {strides = array<i32>} : memref<4x32x128xf32, #tpu.memory_space<vmem>>, vector<1x32x128xf32>,
    %c126_i32_81 = arith.constant 126 : i32
    %146 = tpu.dynamic_rotate %121 by %c126_i32_81 dim 1 : vector<32x128xf32>, i32 -> vector<32x128xf32>
    %c126_i32_82 = arith.constant 126 : i32
    %147 = tpu.dynamic_rotate %119 by %c126_i32_82 dim 1 : vector<32x128xf32>, i32 -> vector<32x128xf32>
    %c30_i32_83 = arith.constant 30 : i32
    %148 = tpu.dynamic_rotate %121 by %c30_i32_83 dim 0 : vector<32x128xf32>, i32 -> vector<32x128xf32>
    %c30_i32_84 = arith.constant 30 : i32
    %149 = tpu.dynamic_rotate %119 by %c30_i32_84 dim 0 : vector<32x128xf32>, i32 -> vector<32x128xf32>
    %150 = arith.subf %121, %146 : vector<32x128xf32>
    %151 = math.absf %150 : vector<32x128xf32>
    %152 = arith.mulf %119, %6 : vector<32x128xf32>
    %153 = arith.mulf %151, %152 : vector<32x128xf32>
    %154 = arith.mulf %153, %147 : vector<32x128xf32>
    %155 = arith.subf %121, %148 : vector<32x128xf32>
    %156 = math.absf %155 : vector<32x128xf32>
    %157 = arith.mulf %119, %14 : vector<32x128xf32>
    %158 = arith.mulf %156, %157 : vector<32x128xf32>
    %159 = arith.mulf %158, %149 : vector<32x128xf32>
    %c1_85 = arith.constant 1 : index
    %c0_86 = arith.constant 0 : index
    %c0_87 = arith.constant 0 : index
    %160 = vector.load %arg7[%c1_85, %c0_86, %c0_87] : memref<4x32x128xf32, #tpu.memory_space<vmem>>, vector<1x32x128xf32>
    %161 = vector.shape_cast %160 : vector<1x32x128xf32> to vector<32x128xf32>
    %162 = arith.addf %154, %159 : vector<32x128xf32>
    %163 = arith.addf %161, %162 : vector<32x128xf32>
    %c1_88 = arith.constant 1 : index
    %c0_89 = arith.constant 0 : index
    %c0_90 = arith.constant 0 : index
    %164 = vector.load %arg7[%c1_88, %c0_89, %c0_90] : memref<4x32x128xf32, #tpu.memory_space<vmem>>, vector<1x32x128xf32>
    %165 = vector.shape_cast %164 : vector<1x32x128xf32> to vector<32x128xf32>
    %166 = vector.shape_cast %163 : vector<32x128xf32> to vector<1x32x128xf32>
    tpu.vector_store %arg7[%c1_88, %c0_89, %c0_90], %166 {strides = array<i32>} : memref<4x32x128xf32, #tpu.memory_space<vmem>>, vector<1x32x128xf32>,
    %c124_i32_91 = arith.constant 124 : i32
    %167 = tpu.dynamic_rotate %121 by %c124_i32_91 dim 1 : vector<32x128xf32>, i32 -> vector<32x128xf32>
    %c124_i32_92 = arith.constant 124 : i32
    %168 = tpu.dynamic_rotate %119 by %c124_i32_92 dim 1 : vector<32x128xf32>, i32 -> vector<32x128xf32>
    %c28_i32_93 = arith.constant 28 : i32
    %169 = tpu.dynamic_rotate %121 by %c28_i32_93 dim 0 : vector<32x128xf32>, i32 -> vector<32x128xf32>
    %c28_i32_94 = arith.constant 28 : i32
    %170 = tpu.dynamic_rotate %119 by %c28_i32_94 dim 0 : vector<32x128xf32>, i32 -> vector<32x128xf32>
    %171 = arith.subf %121, %167 : vector<32x128xf32>
    %172 = math.absf %171 : vector<32x128xf32>
    %173 = arith.mulf %119, %8 : vector<32x128xf32>
    %174 = arith.mulf %172, %173 : vector<32x128xf32>
    %175 = arith.mulf %174, %168 : vector<32x128xf32>
    %176 = arith.subf %121, %169 : vector<32x128xf32>
    %177 = math.absf %176 : vector<32x128xf32>
    %178 = arith.mulf %119, %16 : vector<32x128xf32>
    %179 = arith.mulf %177, %178 : vector<32x128xf32>
    %180 = arith.mulf %179, %170 : vector<32x128xf32>
    %c2_95 = arith.constant 2 : index
    %c0_96 = arith.constant 0 : index
    %c0_97 = arith.constant 0 : index
    %181 = vector.load %arg7[%c2_95, %c0_96, %c0_97] : memref<4x32x128xf32, #tpu.memory_space<vmem>>, vector<1x32x128xf32>
    %182 = vector.shape_cast %181 : vector<1x32x128xf32> to vector<32x128xf32>
    %183 = arith.addf %175, %180 : vector<32x128xf32>
    %184 = arith.addf %182, %183 : vector<32x128xf32>
    %c2_98 = arith.constant 2 : index
    %c0_99 = arith.constant 0 : index
    %c0_100 = arith.constant 0 : index
    %185 = vector.load %arg7[%c2_98, %c0_99, %c0_100] : memref<4x32x128xf32, #tpu.memory_space<vmem>>, vector<1x32x128xf32>
    %186 = vector.shape_cast %185 : vector<1x32x128xf32> to vector<32x128xf32>
    %187 = vector.shape_cast %184 : vector<32x128xf32> to vector<1x32x128xf32>
    tpu.vector_store %arg7[%c2_98, %c0_99, %c0_100], %187 {strides = array<i32>} : memref<4x32x128xf32, #tpu.memory_space<vmem>>, vector<1x32x128xf32>,
    %c120_i32_101 = arith.constant 120 : i32
    %188 = tpu.dynamic_rotate %121 by %c120_i32_101 dim 1 : vector<32x128xf32>, i32 -> vector<32x128xf32>
    %c120_i32_102 = arith.constant 120 : i32
    %189 = tpu.dynamic_rotate %119 by %c120_i32_102 dim 1 : vector<32x128xf32>, i32 -> vector<32x128xf32>
    %c24_i32_103 = arith.constant 24 : i32
    %190 = tpu.dynamic_rotate %121 by %c24_i32_103 dim 0 : vector<32x128xf32>, i32 -> vector<32x128xf32>
    %c24_i32_104 = arith.constant 24 : i32
    %191 = tpu.dynamic_rotate %119 by %c24_i32_104 dim 0 : vector<32x128xf32>, i32 -> vector<32x128xf32>
    %192 = arith.subf %121, %188 : vector<32x128xf32>
    %193 = math.absf %192 : vector<32x128xf32>
    %194 = arith.mulf %119, %10 : vector<32x128xf32>
    %195 = arith.mulf %193, %194 : vector<32x128xf32>
    %196 = arith.mulf %195, %189 : vector<32x128xf32>
    %197 = arith.subf %121, %190 : vector<32x128xf32>
    %198 = math.absf %197 : vector<32x128xf32>
    %199 = arith.mulf %119, %18 : vector<32x128xf32>
    %200 = arith.mulf %198, %199 : vector<32x128xf32>
    %201 = arith.mulf %200, %191 : vector<32x128xf32>
    %c3_105 = arith.constant 3 : index
    %c0_106 = arith.constant 0 : index
    %c0_107 = arith.constant 0 : index
    %202 = vector.load %arg7[%c3_105, %c0_106, %c0_107] : memref<4x32x128xf32, #tpu.memory_space<vmem>>, vector<1x32x128xf32>
    %203 = vector.shape_cast %202 : vector<1x32x128xf32> to vector<32x128xf32>
    %204 = arith.addf %196, %201 : vector<32x128xf32>
    %205 = arith.addf %203, %204 : vector<32x128xf32>
    %c3_108 = arith.constant 3 : index
    %c0_109 = arith.constant 0 : index
    %c0_110 = arith.constant 0 : index
    %206 = vector.load %arg7[%c3_108, %c0_109, %c0_110] : memref<4x32x128xf32, #tpu.memory_space<vmem>>, vector<1x32x128xf32>
    %207 = vector.shape_cast %206 : vector<1x32x128xf32> to vector<32x128xf32>
    %208 = vector.shape_cast %205 : vector<32x128xf32> to vector<1x32x128xf32>
    tpu.vector_store %arg7[%c3_108, %c0_109, %c0_110], %208 {strides = array<i32>} : memref<4x32x128xf32, #tpu.memory_space<vmem>>, vector<1x32x128xf32>,
    %c0_i32_111 = arith.constant 0 : i32
    %209 = arith.cmpi eq, %arg0, %c0_i32_111 : i32
    %210 = arith.extui %209 : i1 to i32
    %c0_i32_112 = arith.constant 0 : i32
    %211 = arith.cmpi ne, %210, %c0_i32_112 : i32
    scf.if %211 {
      %c0_113 = arith.constant 0 : index
      %c0_114 = arith.constant 0 : index
      %212 = vector.load %arg8[%c0_113, %c0_114] : memref<32x128xf32, #tpu.memory_space<vmem>>, vector<32x128xf32>
      %c0_115 = arith.constant 0 : index
      %c0_116 = arith.constant 0 : index
      %c0_117 = arith.constant 0 : index
      %213 = vector.load %arg7[%c0_115, %c0_116, %c0_117] : memref<4x32x128xf32, #tpu.memory_space<vmem>>, vector<1x32x128xf32>
      %214 = vector.shape_cast %213 : vector<1x32x128xf32> to vector<32x128xf32>
      %215 = vector.shape_cast %214 : vector<32x128xf32> to vector<1x32x128xf32>
      %cst = arith.constant dense<0.000000e+00> : vector<1xf32>
      %216 = vector.multi_reduction <add>, %215, %cst [1, 2] : vector<1x32x128xf32> to vector<1xf32>
      %217 = vector.shape_cast %216 : vector<1xf32> to vector<1x1x1xf32>
      %218 = vector.extract %217[0, 0, 0] : f32 from vector<1x1x1xf32>
      %c0_118 = arith.constant 0 : index
      %219 = memref.load %arg5[%c0_118] : memref<4xf32, #tpu.memory_space<smem>>
      memref.store %218, %arg5[%c0_118] : memref<4xf32, #tpu.memory_space<smem>>
      %c0_119 = arith.constant 0 : index
      %c0_120 = arith.constant 0 : index
      %c0_121 = arith.constant 0 : index
      %220 = vector.load %arg1[%c0_119, %c0_120, %c0_121] : memref<12x32x128xf32, #tpu.memory_space<vmem>>, vector<1x32x128xf32>
      %221 = vector.shape_cast %220 : vector<1x32x128xf32> to vector<32x128xf32>
      %222 = arith.mulf %212, %221 : vector<32x128xf32>
      %223 = vector.shape_cast %222 : vector<32x128xf32> to vector<1x32x128xf32>
      %cst_122 = arith.constant dense<0.000000e+00> : vector<1xf32>
      %224 = vector.multi_reduction <add>, %223, %cst_122 [1, 2] : vector<1x32x128xf32> to vector<1xf32>
      %225 = vector.shape_cast %224 : vector<1xf32> to vector<1x1x1xf32>
      %226 = vector.extract %225[0, 0, 0] : f32 from vector<1x1x1xf32>
      %c0_123 = arith.constant 0 : index
      %227 = memref.load %arg6[%c0_123] : memref<4xf32, #tpu.memory_space<smem>>
      memref.store %226, %arg6[%c0_123] : memref<4xf32, #tpu.memory_space<smem>>
      %c1_124 = arith.constant 1 : index
      %c0_125 = arith.constant 0 : index
      %c0_126 = arith.constant 0 : index
      %228 = vector.load %arg7[%c1_124, %c0_125, %c0_126] : memref<4x32x128xf32, #tpu.memory_space<vmem>>, vector<1x32x128xf32>
      %229 = vector.shape_cast %228 : vector<1x32x128xf32> to vector<32x128xf32>
      %230 = vector.shape_cast %229 : vector<32x128xf32> to vector<1x32x128xf32>
      %cst_127 = arith.constant dense<0.000000e+00> : vector<1xf32>
      %231 = vector.multi_reduction <add>, %230, %cst_127 [1, 2] : vector<1x32x128xf32> to vector<1xf32>
      %232 = vector.shape_cast %231 : vector<1xf32> to vector<1x1x1xf32>
      %233 = vector.extract %232[0, 0, 0] : f32 from vector<1x1x1xf32>
      %c1_128 = arith.constant 1 : index
      %234 = memref.load %arg5[%c1_128] : memref<4xf32, #tpu.memory_space<smem>>
      memref.store %233, %arg5[%c1_128] : memref<4xf32, #tpu.memory_space<smem>>
      %c1_129 = arith.constant 1 : index
      %c0_130 = arith.constant 0 : index
      %c0_131 = arith.constant 0 : index
      %235 = vector.load %arg1[%c1_129, %c0_130, %c0_131] : memref<12x32x128xf32, #tpu.memory_space<vmem>>, vector<1x32x128xf32>
      %236 = vector.shape_cast %235 : vector<1x32x128xf32> to vector<32x128xf32>
      %237 = arith.mulf %212, %236 : vector<32x128xf32>
      %238 = vector.shape_cast %237 : vector<32x128xf32> to vector<1x32x128xf32>
      %cst_132 = arith.constant dense<0.000000e+00> : vector<1xf32>
      %239 = vector.multi_reduction <add>, %238, %cst_132 [1, 2] : vector<1x32x128xf32> to vector<1xf32>
      %240 = vector.shape_cast %239 : vector<1xf32> to vector<1x1x1xf32>
      %241 = vector.extract %240[0, 0, 0] : f32 from vector<1x1x1xf32>
      %c1_133 = arith.constant 1 : index
      %242 = memref.load %arg6[%c1_133] : memref<4xf32, #tpu.memory_space<smem>>
      memref.store %241, %arg6[%c1_133] : memref<4xf32, #tpu.memory_space<smem>>
      %c2_134 = arith.constant 2 : index
      %c0_135 = arith.constant 0 : index
      %c0_136 = arith.constant 0 : index
      %243 = vector.load %arg7[%c2_134, %c0_135, %c0_136] : memref<4x32x128xf32, #tpu.memory_space<vmem>>, vector<1x32x128xf32>
      %244 = vector.shape_cast %243 : vector<1x32x128xf32> to vector<32x128xf32>
      %245 = vector.shape_cast %244 : vector<32x128xf32> to vector<1x32x128xf32>
      %cst_137 = arith.constant dense<0.000000e+00> : vector<1xf32>
      %246 = vector.multi_reduction <add>, %245, %cst_137 [1, 2] : vector<1x32x128xf32> to vector<1xf32>
      %247 = vector.shape_cast %246 : vector<1xf32> to vector<1x1x1xf32>
      %248 = vector.extract %247[0, 0, 0] : f32 from vector<1x1x1xf32>
      %c2_138 = arith.constant 2 : index
      %249 = memref.load %arg5[%c2_138] : memref<4xf32, #tpu.memory_space<smem>>
      memref.store %248, %arg5[%c2_138] : memref<4xf32, #tpu.memory_space<smem>>
      %c2_139 = arith.constant 2 : index
      %c0_140 = arith.constant 0 : index
      %c0_141 = arith.constant 0 : index
      %250 = vector.load %arg1[%c2_139, %c0_140, %c0_141] : memref<12x32x128xf32, #tpu.memory_space<vmem>>, vector<1x32x128xf32>
      %251 = vector.shape_cast %250 : vector<1x32x128xf32> to vector<32x128xf32>
      %252 = arith.mulf %212, %251 : vector<32x128xf32>
      %253 = vector.shape_cast %252 : vector<32x128xf32> to vector<1x32x128xf32>
      %cst_142 = arith.constant dense<0.000000e+00> : vector<1xf32>
      %254 = vector.multi_reduction <add>, %253, %cst_142 [1, 2] : vector<1x32x128xf32> to vector<1xf32>
      %255 = vector.shape_cast %254 : vector<1xf32> to vector<1x1x1xf32>
      %256 = vector.extract %255[0, 0, 0] : f32 from vector<1x1x1xf32>
      %c2_143 = arith.constant 2 : index
      %257 = memref.load %arg6[%c2_143] : memref<4xf32, #tpu.memory_space<smem>>
      memref.store %256, %arg6[%c2_143] : memref<4xf32, #tpu.memory_space<smem>>
      %c3_144 = arith.constant 3 : index
      %c0_145 = arith.constant 0 : index
      %c0_146 = arith.constant 0 : index
      %258 = vector.load %arg7[%c3_144, %c0_145, %c0_146] : memref<4x32x128xf32, #tpu.memory_space<vmem>>, vector<1x32x128xf32>
      %259 = vector.shape_cast %258 : vector<1x32x128xf32> to vector<32x128xf32>
      %260 = vector.shape_cast %259 : vector<32x128xf32> to vector<1x32x128xf32>
      %cst_147 = arith.constant dense<0.000000e+00> : vector<1xf32>
      %261 = vector.multi_reduction <add>, %260, %cst_147 [1, 2] : vector<1x32x128xf32> to vector<1xf32>
      %262 = vector.shape_cast %261 : vector<1xf32> to vector<1x1x1xf32>
      %263 = vector.extract %262[0, 0, 0] : f32 from vector<1x1x1xf32>
      %c3_148 = arith.constant 3 : index
      %264 = memref.load %arg5[%c3_148] : memref<4xf32, #tpu.memory_space<smem>>
      memref.store %263, %arg5[%c3_148] : memref<4xf32, #tpu.memory_space<smem>>
      %c3_149 = arith.constant 3 : index
      %c0_150 = arith.constant 0 : index
      %c0_151 = arith.constant 0 : index
      %265 = vector.load %arg1[%c3_149, %c0_150, %c0_151] : memref<12x32x128xf32, #tpu.memory_space<vmem>>, vector<1x32x128xf32>
      %266 = vector.shape_cast %265 : vector<1x32x128xf32> to vector<32x128xf32>
      %267 = arith.mulf %212, %266 : vector<32x128xf32>
      %268 = vector.shape_cast %267 : vector<32x128xf32> to vector<1x32x128xf32>
      %cst_152 = arith.constant dense<0.000000e+00> : vector<1xf32>
      %269 = vector.multi_reduction <add>, %268, %cst_152 [1, 2] : vector<1x32x128xf32> to vector<1xf32>
      %270 = vector.shape_cast %269 : vector<1xf32> to vector<1x1x1xf32>
      %271 = vector.extract %270[0, 0, 0] : f32 from vector<1x1x1xf32>
      %c3_153 = arith.constant 3 : index
      %272 = memref.load %arg6[%c3_153] : memref<4xf32, #tpu.memory_space<smem>>
      memref.store %271, %arg6[%c3_153] : memref<4xf32, #tpu.memory_space<smem>>
    } else {
    }
    return
  }
  func.func @transform_0(%arg0: i32) -> (i32, i32, i32) {
    %c0_i32 = arith.constant 0 : i32
    %c0_i32_0 = arith.constant 0 : i32
    %c0_i32_1 = arith.constant 0 : i32
    %c0_i32_2 = arith.constant 0 : i32
    return %c0_i32, %c0_i32_0, %c0_i32_1 : i32, i32, i32
  }
  func.func @transform_1(%arg0: i32) -> (i32, i32, i32) {
    %c0_i32 = arith.constant 0 : i32
    %c0_i32_0 = arith.constant 0 : i32
    %c0_i32_1 = arith.constant 0 : i32
    return %arg0, %c0_i32, %c0_i32_0 : i32, i32, i32
  }
  func.func @transform_2(%arg0: i32) -> (i32, i32, i32) {
    %c0_i32 = arith.constant 0 : i32
    %c0_i32_0 = arith.constant 0 : i32
    %c0_i32_1 = arith.constant 0 : i32
    return %arg0, %c0_i32, %c0_i32_0 : i32, i32, i32
  }
  func.func @transform_3(%arg0: i32) -> (i32, i32, i32) {
    %c0_i32 = arith.constant 0 : i32
    %c0_i32_0 = arith.constant 0 : i32
    %c0_i32_1 = arith.constant 0 : i32
    return %arg0, %c0_i32, %c0_i32_0 : i32, i32, i32
  }
  func.func @transform_4(%arg0: i32) -> i32 {
    %c0_i32 = arith.constant 0 : i32
    %c0_i32_0 = arith.constant 0 : i32
    return %c0_i32 : i32
  }
  func.func @transform_5(%arg0: i32) -> i32 {
    %c0_i32 = arith.constant 0 : i32
    %c0_i32_0 = arith.constant 0 : i32
    return %c0_i32 : i32
  }
}

</mosaic_0001>

<bundles_post_ra>
// kernel: tpu_custom_call.1
= control target key start
LH: loop header
LB: loop body
LE: loop exit
PB: predicated region body
PF: predicated region fallthrough
CT: control target
= control target key end

     0   :  { %11 = vsyncpa [#allocation5], 0  ;;  %s2345_s0 = inlined_call_operand.hbm [shape: f32[12,32,128], index: 0, kind: input, shape index: {}]   ;;  %s2346_s1 = inlined_call_operand.hbm [shape: f32[2,32,128], index: 1, kind: input, shape index: {}]   ;;  %s2347_s2 = inlined_call_operand.hbm [shape: f32[2,32,128], index: 2, kind: input, shape index: {}]   ;;  %s2348_s3 = inlined_call_operand.hbm [shape: f32[2,32,128], index: 3, kind: input, shape index: {}]   ;;  %s2349_s4 = inlined_call_operand.hbm [shape: f32[4], index: 4, kind: output, shape index: {0}]   ;;  %s2350_s5 = inlined_call_operand.hbm [shape: f32[4], index: 5, kind: output, shape index: {1}]  }
   0x1   :  { %12 = vsyncpa [#allocation8], 0 }
   0x2   :  { %13 = vsyncpa [#allocation11], 0 }
   0x3   :  { %14 = vsyncpa [#allocation6], 0 }
   0x4   :  { %15 = vsyncpa [#allocation14], 0  ;;  %s1222_s18 = smov [#allocation7]   ;;  %s1223_s20 = smov [#allocation4]  }
   0x5   :  { %s33_s19 = sshll.u32 %s1222_s18, 4  ;;  %s21_s21 = sshll.u32 %s1223_s20, 4  ;;  %s34_s19 = int_to_ptr.vmem [resolvable:$true] %s33_s19  ;;  %s22_s21 = int_to_ptr.vmem [resolvable:$true] %s21_s21 }
   0x6   :  { %s1124_s22 = scalar_lea.vmem %s34_s19, 1024  ;;  %p1129_p1 = scmp.lt.s32.totalorder %s34_s19, %s34_s19 }
   0x7   :  { %p1125_p0 = scmp.ne.s32.totalorder %s34_s19, %s1124_s22  ;;  %p1130_p2 = scmp.lt.s32.totalorder %s1124_s22, %s1124_s22 }
   0x9   :  { %p1131_p3 = por %p1130_p2, %p1129_p1 }
   0xb   :  { %p1132_p4 = pnand %p1131_p3, %p1125_p0 }
   0xd   :  { %1135 = shalt.err (!%p1132_p4)
}
   0xe   :  { %s1224_s23 = smov 128   ;;  %s1225_s24 = smov 8  }
   0xf   :  { %39 = dma.hbm_to_vmem [thread:$0]  %s2346_s1, 1024, %s34_s19, [#allocation8], %s1224_s23, %s1224_s23, %s1225_s24  }
  0x10   :  { %s1144_s27 = scalar_lea.vmem %s22_s21, 6144  ;;  %p1149_p6 = scmp.lt.s32.totalorder %s22_s21, %s22_s21 }
  0x11   :  { %p1145_p5 = scmp.ne.s32.totalorder %s22_s21, %s1144_s27  ;;  %p1150_p7 = scmp.lt.s32.totalorder %s1144_s27, %s1144_s27 }
  0x13   :  { %p1151_p8 = por %p1150_p7, %p1149_p6 }
  0x15   :  { %p1152_p9 = pnand %p1151_p8, %p1145_p5 }
  0x17   :  { %1155 = shalt.err (!%p1152_p9)
}
  0x18   :  { %27 = dma.hbm_to_vmem [thread:$0]  %s2345_s0, 6144, %s22_s21, [#allocation5], %s1224_s23, %s1224_s23, %s1225_s24  }
  0x19   :  { %s1226_s30 = smov [#allocation9]   ;;  %s1227_s7 = smov [#allocation10]  }
  0x1a   :  { %s45_s6 = sshll.u32 %s1226_s30, 4  ;;  %s57_s8 = sshll.u32 %s1227_s7, 4  ;;  %s46_s6 = int_to_ptr.vmem [resolvable:$true] %s45_s6  ;;  %s58_s8 = int_to_ptr.vmem [resolvable:$true] %s57_s8 }
  0x1b   :  { %s1164_s1 = scalar_lea.vmem %s46_s6, 1024  ;;  %p1169_p11 = scmp.lt.s32.totalorder %s46_s6, %s46_s6 }
  0x1c   :  { %p1165_p10 = scmp.ne.s32.totalorder %s46_s6, %s1164_s1  ;;  %p1170_p12 = scmp.lt.s32.totalorder %s1164_s1, %s1164_s1 }
  0x1e   :  { %p1171_p13 = por %p1170_p12, %p1169_p11 }
  0x20   :  { %p1172_p0 = pnand %p1171_p13, %p1165_p10 }
  0x22   :  { %1175 = shalt.err (!%p1172_p0)
}
  0x23   :  { %51 = dma.hbm_to_vmem [thread:$0]  %s2347_s2, 1024, %s46_s6, [#allocation8], %s1224_s23, %s1224_s23, %s1225_s24  }
  0x24   :  { %s1184_s0 = scalar_lea.vmem %s58_s8, 1024  ;;  %p1189_p2 = scmp.lt.s32.totalorder %s58_s8, %s58_s8 }
  0x25   :  { %p1185_p1 = scmp.ne.s32.totalorder %s58_s8, %s1184_s0  ;;  %p1190_p3 = scmp.lt.s32.totalorder %s1184_s0, %s1184_s0 }
  0x27   :  { %p1191_p4 = por %p1190_p3, %p1189_p2 }
  0x29   :  { %p1192_p5 = pnand %p1191_p4, %p1185_p1 }
  0x2b   :  { %1195 = shalt.err (!%p1192_p5)
}
  0x2c   :  { %63 = dma.hbm_to_vmem [thread:$0]  %s2348_s3, 1024, %s58_s8, [#allocation11], %s1224_s23, %s1224_s23, %s1225_s24  }
  0x2d   :  { %1212 = dma.done.wait [#allocation5], 6144  }
  0x2e   :  { %1213 = vsyncadd [#allocation5], 4294961152 }
  0x2f   :  { %1214 = dma.done.wait [#allocation8], 2048  }
  0x30   :  { %1215 = vsyncadd [#allocation8], 4294965248 }
  0x31   :  { %1216 = dma.done.wait [#allocation11], 1024  }
  0x32   :  { %1217 = vsyncadd [#allocation11], 4294966272  ;;  %v140_v0 = vld [vmem:[#allocation7] sm:$0xff]  ;;  %v141_v4 = vld [vmem:[#allocation7 + $0x8] sm:$0xff]  ;;  %s1228_s2 = smov 126   ;;  %s1229_s3 = smov 127   ;;  %v192_v41 = vlaneseq }
  0x33   :  { %v144_v1 = vld [vmem:[#allocation9] sm:$0xff]  ;;  %v145_v5 = vld [vmem:[#allocation9 + $0x8] sm:$0xff]  ;;  %s1230_s13 = smov 124   ;;  %s1231_s14 = smov 120   ;;  %v142_v20 = vld [vmem:[#allocation7 + $0x10] sm:$0xff] }
  0x34   :  { %v1288_v2 = vld [vmem:[#allocation10] sm:$0xff]  ;;  %v152_v3 = vsub.f32 %v140_v0, %v144_v1  ;;  %v1290_v6 = vld [vmem:[#allocation10 + $0x8] sm:$0xff]  ;;  %v153_v7 = vsub.f32 %v141_v4, %v145_v5  ;;  %v146_v21 = vld [vmem:[#allocation9 + $0x10] sm:$0xff]  ;;  %v1464_v56 = vshrl.u32 %v192_v41, 7  ;;  %s1232_s22 = smov [#allocation12]   ;;  %s1233_s26 = smov [#allocation13]  }
  0x35   :  { %v518_v10 = vld [vmem:[#allocation7 + $0x28] sm:$0xff]  ;;  %v517_v12 = vld [vmem:[#allocation7 + $0x20] sm:$0xff]  ;;  %v154_v22 = vsub.f32 %v142_v20, %v146_v21  ;;  %v1336_v23 = vld [vmem:[#allocation10 + $0x10] sm:$0xff] }
  0x36   :  { %v1293_v8 = vmul.f32 %v152_v3, %v1288_v2  ;;  %v1300_v9 = vmul.f32 %v153_v7, %v1290_v6  ;;  %v523_v11 = vld [vmem:[#allocation9 + $0x28] sm:$0xff]  ;;  %v522_v13 = vld [vmem:[#allocation9 + $0x20] sm:$0xff]  ;;  %v519_v25 = vld [vmem:[#allocation7 + $0x30] sm:$0xff]  ;;  %vm194_vm0 = vcmp.lt.s32.totalorder %v1464_v56, 7  ;;  %vm283_vm1 = vcmp.lt.s32.totalorder %v1464_v56, 6 }
  0x37   :  { %v532_v14 = vsub.f32 %v518_v10, %v523_v11  ;;  %v531_v15 = vsub.f32 %v517_v12, %v522_v13  ;;  %v1310_v16 = vld [vmem:[#allocation10 + $0x28] sm:$0xff]  ;;  %v1312_v17 = vld [vmem:[#allocation10 + $0x20] sm:$0xff]  ;;  %v1343_v24 = vmul.f32 %v154_v22, %v1336_v23  ;;  %v524_v26 = vld [vmem:[#allocation9 + $0x30] sm:$0xff]  ;;  %vm373_vm2 = vcmp.lt.s32.totalorder %v1464_v56, 4 }
  0x38   :  { %263 = vrot.lane.b32.xlu1 %v1293_v8, %s1228_s2  ;;  %172 = vrot.lane.b32.xlu0 %v1293_v8, %s1229_s3  ;;  %2370 = vst [vmem:[#allocation20_spill] sm:$0xff] %v1312_v17  ;;  %v533_v27 = vsub.f32 %v519_v25, %v524_v26  ;;  %v1349_v28 = vld [vmem:[#allocation10 + $0x30] sm:$0xff]  ;;  %v143_v30 = vld [vmem:[#allocation7 + $0x18] sm:$0xff]  ;;  %v102_v40 = vld [vmem:[#allocation4 + $0x88] sm:$0xff]  ;;  %v1458_v53 = vadd.f32 %v1312_v17, %v1288_v2  ;;  %v189_v10 = vrot.slane %v1300_v9, 1 }
  0x39   :  { %v1319_v18 = vmul.f32 %v532_v14, %v1310_v16  ;;  %v1322_v19 = vmul.f32 %v531_v15, %v1312_v17  ;;  %v147_v31 = vld [vmem:[#allocation9 + $0x18] sm:$0xff]  ;;  %v101_v42 = vld [vmem:[#allocation4 + $0x80] sm:$0xff]  ;;  %v107_v43 = vld [vmem:[#allocation4 + $0xa8] sm:$0xff]  ;;  %v1445_v47 = vmul.f32 %v1290_v6, %v102_v40  ;;  %v1474_v59 = vadd.f32 %v1310_v16, %v1290_v6 }
  0x3a   :  { %v1356_v29 = vmul.f32 %v533_v27, %v1349_v28  ;;  %v155_v32 = vsub.f32 %v143_v30, %v147_v31  ;;  %v1362_v33 = vld [vmem:[#allocation10 + $0x18] sm:$0xff]  ;;  %v106_v44 = vld [vmem:[#allocation4 + $0xa0] sm:$0xff]  ;;  %v112_v45 = vld [vmem:[#allocation4 + $0xc8] sm:$0xff]  ;;  %v1448_v50 = vmul.f32 %v1288_v2, %v101_v42  ;;  %v1451_v51 = vmul.f32 %v1290_v6, %v107_v43 }
  0x3b   :  { %v520_v35 = vld [vmem:[#allocation7 + $0x38] sm:$0xff]  ;;  %v111_v46 = vld [vmem:[#allocation4 + $0xc0] sm:$0xff]  ;;  %2373 = vst [vmem:[#allocation23_spill] sm:$0xff] %v1445_v47  ;;  %v117_v48 = vld [vmem:[#allocation4 + $0xe8] sm:$0xff]  ;;  %v1454_v52 = vmul.f32 %v1288_v2, %v106_v44  ;;  %v1467_v57 = vmul.f32 %v1290_v6, %v112_v45  ;;  %v1484_v0 = vadd.f32 %v1349_v28, %v1336_v23  ;;  %v1492_v3 = vmul.f32 %v1310_v16, %v102_v40 }
  0x3c   :  { %265 = vrot.lane.b32.xlu1 %v1300_v9, %s1228_s2  ;;  %174 = vrot.lane.b32.xlu0 %v1300_v9, %s1229_s3  ;;  %v1369_v34 = vmul.f32 %v155_v32, %v1362_v33  ;;  %v525_v36 = vld [vmem:[#allocation9 + $0x38] sm:$0xff]  ;;  %v116_v49 = vld [vmem:[#allocation4 + $0xe0] sm:$0xff]  ;;  %2374 = vst [vmem:[#allocation24_spill] sm:$0xff] %v1448_v50  ;;  %2375 = vst [vmem:[#allocation25_spill] sm:$0xff] %v1451_v51  ;;  %v1470_v58 = vmul.f32 %v1288_v2, %v111_v46  ;;  %v2351_v11 = vrot.slane %v1343_v24, 1 }
  0x3d   :  { %v534_v37 = vsub.f32 %v520_v35, %v525_v36  ;;  %v1375_v38 = vld [vmem:[#allocation10 + $0x38] sm:$0xff]  ;;  %2376 = vst [vmem:[#allocation26_spill] sm:$0xff] %v1454_v52  ;;  %2377 = vst [vmem:[#allocation27_spill] sm:$0xff] %v1467_v57  ;;  %v953_v60 = vld [vmem:[#allocation4 + $0x20] sm:$0xff]  ;;  %v1477_v62 = vmul.f32 %v1290_v6, %v117_v48  ;;  %v1480_v63 = vmul.f32 %v1288_v2, %v116_v49  ;;  %v2352_v31 = vrot.slane %v1293_v8, 1 }
  0x3e   :  { %2371 = vst [vmem:[#allocation21_spill] sm:$0xff] %v1375_v38  ;;  %2378 = vst [vmem:[#allocation28_spill] sm:$0xff] %v1470_v58  ;;  %v954_v61 = vld [vmem:[#allocation4 + $0x28] sm:$0xff]  ;;  %v957_v1 = vmul.f32 %v953_v60, %v1458_v53  ;;  %v1495_v4 = vmul.f32 %v1312_v17, %v101_v42  ;;  %v955_v5 = vld [vmem:[#allocation4 + $0x30] sm:$0xff]  ;;  %v1501_v12 = vmul.f32 %v1312_v17, %v106_v44  ;;  %v2423_v47 = vrot.slane %v1288_v2, 2 }
  0x3f   :  { %v1382_v39 = vmul.f32 %v534_v37, %v1375_v38  ;;  %2379 = vst [vmem:[#allocation29_spill] sm:$0xff] %v1477_v62  ;;  %2380 = vst [vmem:[#allocation30_spill] sm:$0xff] %v1480_v63  ;;  %v958_v7 = vmul.f32 %v954_v61, %v1474_v59  ;;  %v103_v13 = vld [vmem:[#allocation4 + $0x90] sm:$0xff]  ;;  %v959_v14 = vmul.f32 %v955_v5, %v1484_v0  ;;  %v956_v25 = vld [vmem:[#allocation4 + $0x38] sm:$0xff] }
  0x40   :  { %355 = vrot.lane.b32.xlu1 %v1300_v9, %s1230_s13  ;;  %353 = vrot.lane.b32.xlu0 %v1293_v8, %s1230_s13  ;;  %2381 = vst [vmem:[#allocation31_spill] sm:$0xff] %v1492_v3  ;;  %2382 = vst [vmem:[#allocation32_spill] sm:$0xff] %v1495_v4  ;;  %v1510_v21 = vmul.f32 %v1310_v16, %v107_v43  ;;  %v1514_v22 = vadd.f32 %v1375_v38, %v1362_v33  ;;  %v994_v27 = vld [vmem:[#allocation4 + $0x40] sm:$0xff]  ;;  %v995_v30 = vld [vmem:[#allocation4 + $0x48] sm:$0xff] }
  0x41   :  { %2372 = vst [vmem:[#allocation22_spill] sm:$0xff] %v1382_v39  ;;  %2383 = vst [vmem:[#allocation33_spill] sm:$0xff] %v1501_v12  ;;  %v961_v26 = vadd.f32 %v958_v7, %v957_v1  ;;  %v1518_v32 = vmul.f32 %v1310_v16, %v112_v45  ;;  %v1521_v35 = vmul.f32 %v1312_v17, %v111_v46  ;;  %v108_v37 = vld [vmem:[#allocation4 + $0xb0] sm:$0xff]  ;;  %v280_v7 = vrot.slane %v1300_v9, 2  ;;  %v1647_v3 = vld [vmem:[#allocation4 + $0x120] sm:$0xff] }
  0x42   :  { %2384 = vst [vmem:[#allocation34_spill] sm:$0xff] %v1510_v21  ;;  %v1524_v36 = vmul.f32 %v1312_v17, %v116_v49  ;;  %v113_v40 = vld [vmem:[#allocation4 + $0xd0] sm:$0xff]  ;;  %v960_v41 = vmul.f32 %v956_v25, %v1514_v22  ;;  %v998_v44 = vmul.f32 %v994_v27, %v1458_v53  ;;  %v196_v45 = vsel %vm194_vm0, %v189_v10, %v2351_v11  ;;  %v1035_v27 = vld [vmem:[#allocation4 + $0x60] sm:$0xff]  ;;  %v1036_v11 = vld [vmem:[#allocation4 + $0x68] sm:$0xff] }
  0x43   :  { %2385 = vst [vmem:[#allocation35_spill] sm:$0xff] %v1518_v32  ;;  %2386 = vst [vmem:[#allocation36_spill] sm:$0xff] %v1521_v35  ;;  %v962_v42 = vadd.f32 %v961_v26, %v959_v14  ;;  %v996_v43 = vld [vmem:[#allocation4 + $0x50] sm:$0xff]  ;;  %v1537_v46 = vmul.f32 %v1310_v16, %v117_v48  ;;  %v1540_v49 = vmul.f32 %v1336_v23, %v103_v13  ;;  %v997_v26 = vld [vmem:[#allocation4 + $0x58] sm:$0xff] }
  0x44   :  { %445 = vrot.lane.b32.xlu1 %v1300_v9, %s1231_s14  ;;  %443 = vrot.lane.b32.xlu0 %v1293_v8, %s1231_s14  ;;  %2387 = vst [vmem:[#allocation37_spill] sm:$0xff] %v1524_v36  ;;  %v118_v60 = vld [vmem:[#allocation4 + $0xf0] sm:$0xff]  ;;  %v999_v61 = vmul.f32 %v995_v30, %v1474_v59  ;;  %v1000_v48 = vmul.f32 %v996_v43, %v1484_v0  ;;  %v1585_v14 = vld [vmem:[#allocation4 + $0x108] sm:$0xff]  ;;  %v1597_v35 = vld [vmem:[#allocation4 + $0x100] sm:$0xff] }
  0x45   :  { %2388 = vst [vmem:[#allocation38_spill] sm:$0xff] %v1537_v46  ;;  %2389 = vst [vmem:[#allocation39_spill] sm:$0xff] %v1540_v49  ;;  %v1549_v25 = vadd.f32 %v962_v42, %v960_v41  ;;  %v197_v30 = vsel %vm194_vm0, %v2352_v31, %v189_v10  ;;  %v1558_v49 = vmul.f32 %v1336_v23, %v108_v37  ;;  %v1037_v43 = vld [vmem:[#allocation4 + $0x70] sm:$0xff]  ;;  %v1665_v57 = vld [vmem:[#allocation4 + $0x148] sm:$0xff] }
  0x46   :  { %v1561_v36 = vmul.f32 %v1336_v23, %v113_v40  ;;  %v1001_v41 = vmul.f32 %v997_v26, %v1514_v22  ;;  %v1002_v42 = vadd.f32 %v999_v61, %v998_v44  ;;  %v1039_v10 = vmul.f32 %v1035_v27, %v1458_v53  ;;  %v1704_v52 = vld [vmem:[#allocation4 + $0x168] sm:$0xff] }
  0x47   :  { %2391 = vst [vmem:[#allocation41_spill] sm:$0xff] %v1549_v25  ;;  %2392 = vst [vmem:[#allocation42_spill] sm:$0xff] %v1558_v49  ;;  %v228_v31 = vsub.f32 %v1300_v9, %v196_v45  ;;  %v1572_v25 = vmul.f32 %v1336_v23, %v118_v60  ;;  %v227_v63 = vsub.f32 %v1293_v8, %v197_v30  ;;  %v2397_v44 = vrot.slane %v1343_v24, 2  ;;  %v1038_v45 = vld [vmem:[#allocation4 + $0x78] sm:$0xff] }
  0x48   :  { %553 = vrot.lane.b32.xlu1 %v1319_v18, %s1229_s3  ;;  %551 = vrot.lane.b32.xlu0 %v1322_v19, %s1229_s3  ;;  %2393 = vst [vmem:[#allocation43_spill] sm:$0xff] %v1561_v36  ;;  %v1040_v36 = vmul.f32 %v1036_v11, %v1474_v59  ;;  %v1003_v26 = vadd.f32 %v1002_v42, %v1000_v48 }
  0x49   :  { %2394 = vst [vmem:[#allocation44_spill] sm:$0xff] %v1572_v25  ;;  %v285_v61 = vsel %vm283_vm1, %v280_v7, %v2397_v44  ;;  %v1041_v27 = vmul.f32 %v1037_v43, %v1484_v0  ;;  %v370_v25 = vrot.slane %v1300_v9, 4  ;;  %v1589_v11 = vmul.f32 %v1349_v28, %v108_v37 }
  0x4a   :  { %v1592_v62 = vmul.f32 %v1349_v28, %v103_v13  ;;  %v1595_v30 = vmul.f32 %v1349_v28, %v113_v40  ;;  %v1600_v42 = vadd.f32 %v1003_v26, %v1001_v41  ;;  %v1042_v43 = vmul.f32 %v1038_v45, %v1514_v22  ;;  %v104_v26 = vld [vmem:[#allocation4 + $0x98] sm:$0xff] }
  0x4b   :  { %2398 = vst [vmem:[#allocation47_spill] sm:$0xff] %v1589_v11  ;;  %v1043_v44 = vadd.f32 %v1040_v36, %v1039_v10  ;;  %v317_v32 = vsub.f32 %v1300_v9, %v285_v61  ;;  %v2402_v37 = vrot.slane %v1293_v8, 2  ;;  %v1610_v40 = vmul.f32 %v1349_v28, %v118_v60  ;;  %v1618_v61 = vld [vmem:[#allocation4 + $0x128] sm:$0xff] }
  0x4c   :  { %641 = vrot.lane.b32.xlu1 %v1319_v18, %s1228_s2  ;;  %639 = vrot.lane.b32.xlu0 %v1322_v19, %s1228_s2  ;;  %2399 = vst [vmem:[#allocation48_spill] sm:$0xff] %v1592_v62  ;;  %2400 = vst [vmem:[#allocation49_spill] sm:$0xff] %v1595_v30  ;;  %v232_v41 = vand.u32 2147483647, %v228_v31  ;;  %v236_v36 = vmul.f32 %v1290_v6, %v1585_v14  ;;  %v231_v10 = vand.u32 2147483647, %v227_v63 }
  0x4d   :  { %2401 = vst [vmem:[#allocation50_spill] sm:$0xff] %v1600_v42  ;;  %v286_v13 = vsel %vm283_vm1, %v2402_v37, %v280_v7  ;;  %2403 = vst [vmem:[#allocation51_spill] sm:$0xff] %v1610_v40  ;;  %v1044_v45 = vadd.f32 %v1043_v44, %v1041_v27  ;;  %v200_v7 = vrot.slane %v1290_v6, 1  ;;  %v235_v42 = vmul.f32 %v1288_v2, %v1597_v35  ;;  %v1625_v40 = vld [vmem:[#allocation4 + $0xb8] sm:$0xff] }
  0x4e   :  { %v1627_v31 = vld [vmem:[#allocation4 + $0xf8] sm:$0xff]  ;;  %v316_v63 = vsub.f32 %v1293_v8, %v286_v13  ;;  %v2406_v11 = vrot.slane %v1343_v24, 4  ;;  %v289_v60 = vrot.slane %v1290_v6, 2  ;;  %v321_v21 = vand.u32 2147483647, %v317_v32 }
  0x4f   :  { %v1629_v62 = vld [vmem:[#allocation4 + $0xd8] sm:$0xff]  ;;  %v1637_v37 = vadd.f32 %v1044_v45, %v1042_v43  ;;  %v325_v58 = vmul.f32 %v1290_v6, %v1618_v61  ;;  %v1654_v43 = vmul.f32 %v1362_v33, %v104_v26  ;;  %v1658_v45 = vmul.f32 %v1362_v33, %v1627_v31 }
  0x50   :  { %729 = vrot.lane.b32.xlu1 %v1319_v18, %s1230_s13  ;;  %727 = vrot.lane.b32.xlu0 %v1322_v19, %s1230_s13  ;;  %2405 = vst [vmem:[#allocation53_spill] sm:$0xff] %v1629_v62  ;;  %v375_v27 = vsel %vm373_vm2, %v370_v25, %v2406_v11  ;;  %v1651_v11 = vmul.f32 %v1362_v33, %v1625_v40 }
  0x51   :  { %2407 = vst [vmem:[#allocation54_spill] sm:$0xff] %v1637_v37  ;;  %2411 = vst [vmem:[#allocation58_spill] sm:$0xff] %v1654_v43  ;;  %v1662_v32 = vmul.f32 %v1362_v33, %v1629_v62  ;;  %v240_v12 = vmul.f32 %v236_v36, %v232_v41  ;;  %v239_v44 = vmul.f32 %v235_v42, %v231_v10  ;;  %v2417_v42 = vrot.slane %v1293_v8, 4  ;;  %v1695_v41 = vld [vmem:[#allocation4 + $0x140] sm:$0xff] }
  0x52   :  { %2410 = vst [vmem:[#allocation57_spill] sm:$0xff] %v1651_v11  ;;  %2412 = vst [vmem:[#allocation59_spill] sm:$0xff] %v1658_v45  ;;  %v407_v37 = vsub.f32 %v1300_v9, %v375_v27  ;;  %v1668_v51 = vmul.f32 %v1375_v38, %v104_v26  ;;  %v2415_v11 = vrot.slane %v1336_v23, 1  ;;  %v2416_v45 = vrot.slane %v1288_v2, 1 }
  0x53   :  { %2413 = vst [vmem:[#allocation60_spill] sm:$0xff] %v1662_v32  ;;  %v376_v36 = vsel %vm373_vm2, %v2417_v42, %v370_v25  ;;  %v2418_v10 = vrot.slane %v1336_v23, 2  ;;  %v329_v27 = vmul.f32 %v325_v58, %v321_v21  ;;  %v320_v32 = vand.u32 2147483647, %v316_v63 }
  0x54   :  { %817 = vrot.lane.b32.xlu1 %v1319_v18, %s1231_s14  ;;  %815 = vrot.lane.b32.xlu0 %v1322_v19, %s1231_s14  ;;  %2414 = vst [vmem:[#allocation61_spill] sm:$0xff] %v1668_v51  ;;  %v204_v43 = vsel %vm194_vm0, %v200_v7, %v2415_v11  ;;  %v205_v62 = vsel %vm194_vm0, %v2416_v45, %v200_v7  ;;  %v568_v42 = vrot.slane %v1319_v18, 1  ;;  %v379_v21 = vrot.slane %v1290_v6, 4 }
  0x55   :  { %v293_v26 = vsel %vm283_vm1, %v289_v60, %v2418_v10  ;;  %v324_v11 = vmul.f32 %v1288_v2, %v1647_v3  ;;  %v415_v45 = vmul.f32 %v1290_v6, %v1665_v57  ;;  %v480_v25 = vsub.f32 %v1300_v9, %v1343_v24 }
  0x56   :  { %v411_v10 = vand.u32 2147483647, %v407_v37  ;;  %v1706_v50 = vmul.f32 %v240_v12, %v204_v43  ;;  %v414_v37 = vmul.f32 %v1288_v2, %v1695_v41  ;;  %v912_v12 = vld [vmem:[#allocation4] sm:$0xff]  ;;  %v913_v43 = vld [vmem:[#allocation4 + $0x8] sm:$0xff]  ;;  %v656_v63 = vrot.slane %v1319_v18, 2 }
  0x58   :  { %267 = vrot.lane.b32.xlu1 %v1343_v24, %s1228_s2  ;;  %176 = vrot.lane.b32.xlu0 %v1343_v24, %s1229_s3  ;;  %2421 = vst [vmem:[#allocation64_spill] sm:$0xff] %v1706_v50 }
  0x5c   :  { %447 = vrot.lane.b32.xlu1 %v1343_v24, %s1231_s14  ;;  %357 = vrot.lane.b32.xlu0 %v1343_v24, %s1230_s13 }
  0x60   :  { %643 = vrot.lane.b32.xlu1 %v1356_v29, %s1228_s2  ;;  %555 = vrot.lane.b32.xlu0 %v1356_v29, %s1229_s3 }
  0x64   :  { %819 = vrot.lane.b32.xlu1 %v1356_v29, %s1231_s14  ;;  %731 = vrot.lane.b32.xlu0 %v1356_v29, %s1230_s13 }
  0x68   :  { %269 = vrot.lane.b32.xlu1 %v1369_v34, %s1228_s2  ;;  %178 = vrot.lane.b32.xlu0 %v1369_v34, %s1229_s3 }
  0x6c   :  { %449 = vrot.lane.b32.xlu1 %v1369_v34, %s1231_s14  ;;  %359 = vrot.lane.b32.xlu0 %v1369_v34, %s1230_s13 }
  0x70   :  { %645 = vrot.lane.b32.xlu1 %v1382_v39, %s1228_s2  ;;  %557 = vrot.lane.b32.xlu0 %v1382_v39, %s1229_s3 }
  0x74   :  { %821 = vrot.lane.b32.xlu1 %v1382_v39, %s1231_s14  ;;  %733 = vrot.lane.b32.xlu0 %v1382_v39, %s1230_s13 }
  0x78   :  { %182 = vrot.lane.b32.xlu1 %v1290_v6, %s1229_s3  ;;  %180 = vrot.lane.b32.xlu0 %v1288_v2, %s1229_s3 }
  0x7c   :  { %273 = vrot.lane.b32.xlu1 %v1290_v6, %s1228_s2  ;;  %271 = vrot.lane.b32.xlu0 %v1288_v2, %s1228_s2 }
  0x80   :  { %363 = vrot.lane.b32.xlu1 %v1290_v6, %s1230_s13  ;;  %361 = vrot.lane.b32.xlu0 %v1288_v2, %s1230_s13 }
  0x84   :  { %453 = vrot.lane.b32.xlu1 %v1290_v6, %s1231_s14  ;;  %451 = vrot.lane.b32.xlu0 %v1288_v2, %s1231_s14 }
  0x88   :  { %561 = vrot.lane.b32.xlu1 %v1310_v16, %s1229_s3  ;;  %559 = vrot.lane.b32.xlu0 %v1312_v17, %s1229_s3 }
  0x8c   :  { %649 = vrot.lane.b32.xlu1 %v1310_v16, %s1228_s2  ;;  %647 = vrot.lane.b32.xlu0 %v1312_v17, %s1228_s2 }
  0x90   :  { %737 = vrot.lane.b32.xlu1 %v1310_v16, %s1230_s13  ;;  %735 = vrot.lane.b32.xlu0 %v1312_v17, %s1230_s13 }
  0x94   :  { %825 = vrot.lane.b32.xlu1 %v1310_v16, %s1231_s14  ;;  %823 = vrot.lane.b32.xlu0 %v1312_v17, %s1231_s14 }
  0x98   :  { %275 = vrot.lane.b32.xlu1 %v1336_v23, %s1228_s2  ;;  %184 = vrot.lane.b32.xlu0 %v1336_v23, %s1229_s3 }
  0x9c   :  { %455 = vrot.lane.b32.xlu1 %v1336_v23, %s1231_s14  ;;  %365 = vrot.lane.b32.xlu0 %v1336_v23, %s1230_s13 }
  0xa0   :  { %651 = vrot.lane.b32.xlu1 %v1349_v28, %s1228_s2  ;;  %563 = vrot.lane.b32.xlu0 %v1349_v28, %s1229_s3 }
  0xa4   :  { %827 = vrot.lane.b32.xlu1 %v1349_v28, %s1231_s14  ;;  %739 = vrot.lane.b32.xlu0 %v1349_v28, %s1230_s13 }
  0xa8   :  { %277 = vrot.lane.b32.xlu1 %v1362_v33, %s1228_s2  ;;  %186 = vrot.lane.b32.xlu0 %v1362_v33, %s1229_s3 }
  0xaa   :  { %v1460_v54 = vpop.permute.xlu1 %263  ;;  %v1462_v55 = vpop.permute.xlu0 %172 }
  0xac   :  { %457 = vrot.lane.b32.xlu1 %v1362_v33, %s1231_s14  ;;  %367 = vrot.lane.b32.xlu0 %v1362_v33, %s1230_s13 }
  0xae   :  { %v1504_v15 = vpop.permute.xlu1 %265  ;;  %v1506_v20 = vpop.permute.xlu0 %174 }
  0xb0   :  { %653 = vrot.lane.b32.xlu1 %v1375_v38, %s1228_s2  ;;  %565 = vrot.lane.b32.xlu0 %v1375_v38, %s1229_s3 }
  0xb2   :  { %v1543_v1 = vpop.permute.xlu1 %355  ;;  %v1545_v5 = vpop.permute.xlu0 %353 }
  0xb3   :  { %2390 = vst [vmem:[#allocation40_spill] sm:$0xff] %v1545_v5 }
  0xb4   :  { %829 = vrot.lane.b32.xlu1 %v1375_v38, %s1231_s14  ;;  %741 = vrot.lane.b32.xlu0 %v1375_v38, %s1230_s13 }
  0xb6   :  { %v1575_v49 = vpop.permute.xlu1 %445  ;;  %v1577_v46 = vpop.permute.xlu0 %443 }
  0xb7   :  { %2395 = vst [vmem:[#allocation45_spill] sm:$0xff] %v1575_v49  ;;  %2396 = vst [vmem:[#allocation46_spill] sm:$0xff] %v1577_v46  ;;  %v406_v46 = vsub.f32 %v1293_v8, %v376_v36  ;;  %v1708_v49 = vmul.f32 %v239_v44, %v205_v62  ;;  %v479_v36 = vsub.f32 %v1293_v8, %v1300_v9 }
  0xb9   :  { %2422 = vst [vmem:[#allocation65_spill] sm:$0xff] %v1708_v49  ;;  %v410_v49 = vand.u32 2147483647, %v406_v46  ;;  %v483_v5 = vand.u32 2147483647, %v479_v36 }
  0xba   :  { %v1612_v30 = vpop.permute.xlu1 %553  ;;  %v1614_v48 = vpop.permute.xlu0 %551 }
  0xbb   :  { %2404 = vst [vmem:[#allocation52_spill] sm:$0xff] %v1614_v48 }
  0xbe   :  { %v1643_v4 = vpop.permute.xlu1 %641  ;;  %v1645_v13 = vpop.permute.xlu0 %639 }
  0xbf   :  { %2408 = vst [vmem:[#allocation55_spill] sm:$0xff] %v1643_v4  ;;  %2409 = vst [vmem:[#allocation56_spill] sm:$0xff] %v1645_v13  ;;  %v328_v13 = vmul.f32 %v324_v11, %v320_v32  ;;  %v2427_v32 = vrot.slane %v1356_v29, 1  ;;  %v2428_v11 = vrot.slane %v1336_v23, 4 }
  0xc1   :  { %v383_v58 = vsel %vm373_vm2, %v379_v21, %v2428_v11 }
  0xc2   :  { %v1689_v51 = vpop.permute.xlu1 %729  ;;  %v1691_v7 = vpop.permute.xlu0 %727 }
  0xc3   :  { %2419 = vst [vmem:[#allocation62_spill] sm:$0xff] %v1689_v51  ;;  %2420 = vst [vmem:[#allocation63_spill] sm:$0xff] %v1691_v7  ;;  %v294_v7 = vsel %vm283_vm1, %v2423_v47, %v289_v60  ;;  %v1715_v51 = vmul.f32 %v329_v27, %v293_v26  ;;  %v484_v47 = vand.u32 2147483647, %v480_v25  ;;  %v488_v60 = vmul.f32 %v1290_v6, %v1704_v52  ;;  %v1728_v26 = vld [vmem:[#allocation4 + $0x160] sm:$0xff] }
  0xc4   :  { %v572_v27 = vsel %vm194_vm0, %v568_v42, %v2427_v32  ;;  %v2429_v25 = vrot.slane %v1322_v19, 1  ;;  %v917_v32 = vmul.f32 %v913_v43, %v1474_v59  ;;  %v1746_v4 = vmul.f32 %v328_v13, %v294_v7 }
  0xc5   :  { %2424 = vst [vmem:[#allocation66_spill] sm:$0xff] %v1715_v51  ;;  %v419_v51 = vmul.f32 %v415_v45, %v411_v10  ;;  %v487_v45 = vmul.f32 %v1288_v2, %v1728_v26  ;;  %v604_v46 = vsub.f32 %v1319_v18, %v572_v27  ;;  %v914_v10 = vld [vmem:[#allocation4 + $0x10] sm:$0xff]  ;;  %v1762_v13 = vmul.f32 %v1375_v38, %v1625_v40 }
  0xc6   :  { %v1721_v62 = vpop.permute.xlu1 %817  ;;  %v1723_v44 = vpop.permute.xlu0 %815  ;;  %v573_v50 = vsel %vm194_vm0, %v2429_v25, %v568_v42  ;;  %v2430_v42 = vrot.slane %v1288_v2, 4  ;;  %v744_v43 = vrot.slane %v1319_v18, 4  ;;  %v418_v25 = vmul.f32 %v414_v37, %v410_v49 }
  0xc7   :  { %2425 = vst [vmem:[#allocation67_spill] sm:$0xff] %v1721_v62  ;;  %2426 = vst [vmem:[#allocation68_spill] sm:$0xff] %v1723_v44  ;;  %v2354_v44 = vrot.slane %v1356_v29, 2  ;;  %v916_v62 = vmul.f32 %v912_v12, %v1458_v53  ;;  %v492_v12 = vmul.f32 %v488_v60, %v484_v47  ;;  %v1764_v7 = vmul.f32 %v419_v51, %v383_v58  ;;  %v915_v58 = vld [vmem:[#allocation4 + $0x18] sm:$0xff] }
  0xc8   :  { %v384_v53 = vsel %vm373_vm2, %v2430_v42, %v379_v21  ;;  %2431 = vst [vmem:[#allocation69_spill] sm:$0xff] %v1762_v13  ;;  %v603_v36 = vsub.f32 %v1322_v19, %v573_v50  ;;  %v918_v47 = vmul.f32 %v914_v10, %v1484_v0  ;;  %v491_v42 = vmul.f32 %v487_v45, %v483_v5 }
  0xc9   :  { %v660_v21 = vsel %vm283_vm1, %v656_v63, %v2354_v44  ;;  %v920_v60 = vadd.f32 %v917_v32, %v916_v62  ;;  %v576_v40 = vrot.slane %v1310_v16, 1  ;;  %v608_v51 = vand.u32 2147483647, %v604_v46 }
  0xca   :  { %v1751_v11 = vpop.permute.xlu1 %267  ;;  %v1753_v48 = vpop.permute.xlu0 %176  ;;  %v612_v50 = vmul.f32 %v1310_v16, %v1585_v14  ;;  %v611_v0 = vmul.f32 %v1312_v17, %v1597_v35  ;;  %v2434_v5 = vrot.slane %v1322_v19, 2  ;;  %v607_v32 = vand.u32 2147483647, %v603_v36 }
  0xcb   :  { %v692_v14 = vsub.f32 %v1319_v18, %v660_v21  ;;  %v2435_v45 = vrot.slane %v1356_v29, 4  ;;  %v664_v44 = vrot.slane %v1310_v16, 2  ;;  %v2356_v37 = vrot.slane %v1349_v28, 2 }
  0xcc   :  { %v661_v62 = vsel %vm283_vm1, %v2434_v5, %v656_v63  ;;  %v919_v35 = vmul.f32 %v915_v58, %v1514_v22  ;;  %v921_v49 = vadd.f32 %v920_v60, %v918_v47  ;;  %v1799_v13 = vmul.f32 %v492_v12, %v1336_v23 }
  0xcd   :  { %v748_v46 = vsel %vm373_vm2, %v744_v43, %v2435_v45  ;;  %v616_v63 = vmul.f32 %v612_v50, %v608_v51  ;;  %v2355_v36 = vrot.slane %v1312_v17, 2  ;;  %v691_v21 = vsub.f32 %v1322_v19, %v661_v62 }
  0xce   :  { %v1777_v59 = vpop.permute.xlu1 %447  ;;  %v1779_v27 = vpop.permute.xlu0 %357  ;;  %2436 = vst [vmem:[#allocation72_spill] sm:$0xff] %v1799_v13  ;;  %v1807_v10 = vmul.f32 %v418_v25, %v384_v53  ;;  %v2440_v22 = vrot.slane %v1349_v28, 1  ;;  %v780_v47 = vsub.f32 %v1319_v18, %v748_v46  ;;  %v2441_v60 = vrot.slane %v1312_v17, 1 }
  0xcf   :  { %2432 = vst [vmem:[#allocation70_spill] sm:$0xff] %v1777_v59  ;;  %2433 = vst [vmem:[#allocation71_spill] sm:$0xff] %v1779_v27  ;;  %v1810_v27 = vmul.f32 %v491_v42, %v1290_v6  ;;  %v696_v50 = vand.u32 2147483647, %v692_v14  ;;  %v700_v53 = vmul.f32 %v1310_v16, %v1618_v61  ;;  %v2442_v25 = vrot.slane %v1322_v19, 4 }
  0xd0   :  { %v580_v12 = vsel %vm194_vm0, %v576_v40, %v2440_v22  ;;  %v581_v51 = vsel %vm194_vm0, %v2441_v60, %v576_v40  ;;  %v615_v42 = vmul.f32 %v611_v0, %v607_v32  ;;  %v668_v58 = vsel %vm283_vm1, %v664_v44, %v2356_v37 }
  0xd1   :  { %2439 = vst [vmem:[#allocation75_spill] sm:$0xff] %v1810_v27  ;;  %v749_v6 = vsel %vm373_vm2, %v2442_v25, %v744_v43  ;;  %v852_v62 = vsub.f32 %v1319_v18, %v1356_v29  ;;  %v922_v46 = vadd.f32 %v921_v49, %v919_v35  ;;  %v1833_v40 = vmul.f32 %v616_v63, %v580_v12 }
  0xd2   :  { %v1803_v5 = vpop.permute.xlu1 %643  ;;  %v1805_v45 = vpop.permute.xlu0 %555  ;;  %v669_v61 = vsel %vm283_vm1, %v2355_v36, %v664_v44  ;;  %v695_v14 = vand.u32 2147483647, %v691_v21  ;;  %v699_v43 = vmul.f32 %v1312_v17, %v1647_v3  ;;  %v784_v22 = vand.u32 2147483647, %v780_v47 }
  0xd3   :  { %2437 = vst [vmem:[#allocation73_spill] sm:$0xff] %v1803_v5  ;;  %2438 = vst [vmem:[#allocation74_spill] sm:$0xff] %v1805_v45  ;;  %v788_v60 = vmul.f32 %v1310_v16, %v1665_v57  ;;  %v779_v49 = vsub.f32 %v1322_v19, %v749_v6  ;;  %v2357_v35 = vrot.slane %v1369_v34, 2  ;;  %v704_v63 = vmul.f32 %v700_v53, %v696_v50 }
  0xd4   :  { %v752_v12 = vrot.slane %v1310_v16, 4  ;;  %v856_v3 = vand.u32 2147483647, %v852_v62  ;;  %v860_v25 = vmul.f32 %v1310_v16, %v1704_v52  ;;  %v851_v47 = vsub.f32 %v1322_v19, %v1319_v18 }
  0xd5   :  { %v703_v6 = vmul.f32 %v699_v43, %v695_v14  ;;  %v792_v62 = vmul.f32 %v788_v60, %v784_v22  ;;  %v783_v44 = vand.u32 2147483647, %v779_v49  ;;  %v787_v52 = vmul.f32 %v1312_v17, %v1695_v41 }
  0xd6   :  { %v1841_v0 = vpop.permute.xlu1 %819  ;;  %v1843_v32 = vpop.permute.xlu0 %731  ;;  %v1872_v43 = vmul.f32 %v615_v42, %v581_v51  ;;  %v1874_v36 = vmul.f32 %v704_v63, %v668_v58  ;;  %v2448_v53 = vrot.slane %v1349_v28, 4  ;;  %v2449_v60 = vrot.slane %v1369_v34, 1  ;;  %v128_v42 = vld [vmem:[#allocation4 + $0x130] sm:$0xff] }
  0xd7   :  { %2443 = vst [vmem:[#allocation76_spill] sm:$0xff] %v1841_v0  ;;  %2444 = vst [vmem:[#allocation77_spill] sm:$0xff] %v1843_v32  ;;  %v2450_v41 = vrot.slane %v1343_v24, 1  ;;  %v864_v50 = vmul.f32 %v860_v25, %v856_v3  ;;  %v855_v57 = vand.u32 2147483647, %v851_v47  ;;  %v859_v51 = vmul.f32 %v1312_v17, %v1728_v26  ;;  %v123_v32 = vld [vmem:[#allocation4 + $0x110] sm:$0xff] }
  0xd8   :  { %923 = vadd.xlane.f32.xlu1 %v922_v46  ;;  %v2447_v46 = vrot.slane %v1343_v24, 2  ;;  %v756_v22 = vsel %vm373_vm2, %v752_v12, %v2448_v53  ;;  %v2451_v58 = vrot.slane %v1369_v34, 4  ;;  %v2452_v63 = vrot.slane %v1343_v24, 4 }
  0xd9   :  { %v195_v49 = vsel %vm194_vm0, %v2450_v41, %v2449_v60  ;;  %v2454_v3 = vrot.slane %v1356_v29, 2  ;;  %v2455_v26 = vrot.slane %v1382_v39, 1  ;;  %v2456_v47 = vrot.slane %v1356_v29, 1 }
  0xda   :  { %v1860_v37 = vpop.permute.xlu1 %269  ;;  %v1862_v21 = vpop.permute.xlu0 %178  ;;  %v284_v14 = vsel %vm283_vm1, %v2447_v46, %v2357_v35  ;;  %v374_v53 = vsel %vm373_vm2, %v2452_v63, %v2451_v58  ;;  %v1894_v46 = vmul.f32 %v703_v6, %v669_v61  ;;  %v1913_v6 = vmul.f32 %v792_v62, %v756_v22 }
  0xdb   :  { %2445 = vst [vmem:[#allocation78_spill] sm:$0xff] %v1860_v37  ;;  %2446 = vst [vmem:[#allocation79_spill] sm:$0xff] %v1862_v21  ;;  %v318_v35 = vsub.f32 %v1343_v24, %v284_v14  ;;  %v2453_v21 = vrot.slane %v1382_v39, 2  ;;  %v571_v60 = vsel %vm194_vm0, %v2456_v47, %v2455_v26  ;;  %v2459_v14 = vrot.slane %v1312_v17, 4  ;;  %v138_v47 = vld [vmem:[#allocation4 + $0x170] sm:$0xff] }
  0xdc   :  { %v791_v63 = vmul.f32 %v787_v52, %v783_v44  ;;  %v326_v37 = vmul.f32 %v1336_v23, %v128_v42  ;;  %v481_v26 = vsub.f32 %v1343_v24, %v1369_v34  ;;  %v408_v62 = vsub.f32 %v1343_v24, %v374_v53 }
  0xdd   :  { %v659_v25 = vsel %vm283_vm1, %v2454_v3, %v2453_v21  ;;  %v757_v58 = vsel %vm373_vm2, %v2459_v14, %v752_v12  ;;  %v229_v21 = vsub.f32 %v1343_v24, %v195_v49  ;;  %v1926_v22 = vmul.f32 %v864_v50, %v1349_v28 }
  0xde   :  { %v1909_v41 = vpop.permute.xlu1 %449  ;;  %v1911_v61 = vpop.permute.xlu0 %359  ;;  %v693_v12 = vsub.f32 %v1356_v29, %v659_v25  ;;  %v605_v44 = vsub.f32 %v1356_v29, %v571_v60  ;;  %v322_v52 = vand.u32 2147483647, %v318_v35  ;;  %v853_v14 = vsub.f32 %v1356_v29, %v1382_v39 }
  0xdf   :  { %2457 = vst [vmem:[#allocation80_spill] sm:$0xff] %v1909_v41  ;;  %2458 = vst [vmem:[#allocation81_spill] sm:$0xff] %v1911_v61  ;;  %v863_v61 = vmul.f32 %v859_v51, %v855_v57  ;;  %v133_v41 = vld [vmem:[#allocation4 + $0x150] sm:$0xff]  ;;  %v233_v50 = vand.u32 2147483647, %v229_v21  ;;  %v237_v57 = vmul.f32 %v1336_v23, %v123_v32  ;;  %v489_v51 = vmul.f32 %v1336_v23, %v138_v47 }
  0xe0   :  { %2460 = vst [vmem:[#allocation82_spill] sm:$0xff] %v1926_v22  ;;  %v485_v60 = vand.u32 2147483647, %v481_v26  ;;  %v412_v35 = vand.u32 2147483647, %v408_v62  ;;  %v416_v49 = vmul.f32 %v1336_v23, %v133_v41  ;;  %v701_v0 = vmul.f32 %v1349_v28, %v128_v42 }
  0xe1   :  { %v697_v3 = vand.u32 2147483647, %v693_v12  ;;  %v609_v22 = vand.u32 2147483647, %v605_v44  ;;  %v861_v21 = vmul.f32 %v1349_v28, %v138_v47  ;;  %v2463_v27 = vrot.slane %v1382_v39, 4 }
  0xe2   :  { %v1934_v17 = vpop.permute.xlu1 %645  ;;  %v1936_v53 = vpop.permute.xlu0 %557  ;;  %v2464_v13 = vrot.slane %v1356_v29, 4  ;;  %v2465_v62 = vrot.slane %v1293_v8, 2  ;;  %v2466_v42 = vrot.slane %v1369_v34, 2  ;;  %v2469_v47 = vrot.slane %v1362_v33, 2 }
  0xe3   :  { %2461 = vst [vmem:[#allocation83_spill] sm:$0xff] %v1934_v17  ;;  %2462 = vst [vmem:[#allocation84_spill] sm:$0xff] %v1936_v53  ;;  %v613_v17 = vmul.f32 %v1349_v28, %v123_v32  ;;  %v857_v53 = vand.u32 2147483647, %v853_v14  ;;  %v1962_v14 = vmul.f32 %v791_v63, %v757_v58  ;;  %v2470_v59 = vrot.slane %v1336_v23, 2 }
  0xe4   :  { %v747_v26 = vsel %vm373_vm2, %v2464_v13, %v2463_v27  ;;  %v287_v12 = vsel %vm283_vm1, %v2466_v42, %v2465_v62  ;;  %v330_v27 = vmul.f32 %v326_v37, %v322_v52  ;;  %v2471_v45 = vrot.slane %v1362_v33, 1 }
  0xe5   :  { %v292_v13 = vsel %vm283_vm1, %v2470_v59, %v2469_v47  ;;  %v2472_v62 = vrot.slane %v1336_v23, 1  ;;  %v493_v58 = vmul.f32 %v489_v51, %v485_v60  ;;  %v420_v63 = vmul.f32 %v416_v49, %v412_v35 }
  0xe6   :  { %v1958_v44 = vpop.permute.xlu1 %821  ;;  %v1960_v32 = vpop.permute.xlu0 %733  ;;  %v2474_v5 = vrot.slane %v1336_v23, 4  ;;  %v705_v37 = vmul.f32 %v701_v0, %v697_v3  ;;  %v781_v52 = vsub.f32 %v1356_v29, %v747_v26  ;;  %v319_v47 = vsub.f32 %v1369_v34, %v287_v12  ;;  %v1992_v23 = vld [vmem:[#allocation4 + $0x138] sm:$0xff] }
  0xe7   :  { %2467 = vst [vmem:[#allocation85_spill] sm:$0xff] %v1958_v44  ;;  %2468 = vst [vmem:[#allocation86_spill] sm:$0xff] %v1960_v32  ;;  %v203_v42 = vsel %vm194_vm0, %v2472_v62, %v2471_v45  ;;  %v241_v32 = vmul.f32 %v237_v57, %v233_v50  ;;  %v2473_v44 = vrot.slane %v1362_v33, 4  ;;  %v2475_v25 = vrot.slane %v1375_v38, 2  ;;  %v2023_v26 = vld [vmem:[#allocation4 + $0x118] sm:$0xff] }
  0xe8   :  { %v2476_v39 = vrot.slane %v1349_v28, 2  ;;  %v617_v49 = vmul.f32 %v613_v17, %v609_v22  ;;  %v865_v50 = vmul.f32 %v861_v21, %v857_v53  ;;  %v2362_v57 = vrot.slane %v1375_v38, 4  ;;  %2477 = vst [vmem:[#allocation87_spill] sm:$0xff] %v1992_v23  ;;  %2486 = vst [vmem:[#allocation92_spill] sm:$0xff] %v2023_v26 }
  0xe9   :  { %v382_v59 = vsel %vm373_vm2, %v2474_v5, %v2473_v44  ;;  %v1999_v0 = vmul.f32 %v863_v61, %v1310_v16  ;;  %v2001_v3 = vmul.f32 %v330_v27, %v292_v13  ;;  %v2479_v60 = vrot.slane %v1375_v38, 1 }
  0xea   :  { %v667_v45 = vsel %vm283_vm1, %v2476_v39, %v2475_v25  ;;  %v1994_v51 = vpop.permute.xlu1 %182  ;;  %v1996_v5 = vpop.permute.xlu0 %180  ;;  %v2480_v35 = vrot.slane %v1349_v28, 1  ;;  %v2481_v39 = vrot.slane %v1293_v8, 1  ;;  %v2482_v22 = vrot.slane %v1369_v34, 1 }
  0xeb   :  { %2478 = vst [vmem:[#allocation88_spill] sm:$0xff] %v2001_v3  ;;  %v2015_v25 = vmul.f32 %v241_v32, %v203_v42  ;;  %v2018_v16 = vmul.f32 %v493_v58, %v1362_v33  ;;  %v2020_v61 = vmul.f32 %v420_v63, %v382_v59  ;;  %v789_v21 = vmul.f32 %v1349_v28, %v133_v41 }
  0xec   :  { %v579_v17 = vsel %vm194_vm0, %v2480_v35, %v2479_v60  ;;  %v198_v53 = vsel %vm194_vm0, %v2482_v22, %v2481_v39  ;;  %v2025_v12 = vmul.f32 %v705_v37, %v667_v45  ;;  %v785_v44 = vand.u32 2147483647, %v781_v52  ;;  %v2071_v39 = vld [vmem:[#allocation4 + $0x178] sm:$0xff] }
  0xed   :  { %2483 = vst [vmem:[#allocation89_spill] sm:$0xff] %v2015_v25  ;;  %2484 = vst [vmem:[#allocation90_spill] sm:$0xff] %v2018_v16  ;;  %v323_v13 = vand.u32 2147483647, %v319_v47  ;;  %v327_v27 = vmul.f32 %v1362_v33, %v1992_v23  ;;  %v2029_v62 = vmul.f32 %v617_v49, %v579_v17  ;;  %v2032_v32 = vmul.f32 %v865_v50, %v1375_v38 }
  0xee   :  { %2485 = vst [vmem:[#allocation91_spill] sm:$0xff] %v2020_v61  ;;  %2487 = vst [vmem:[#allocation93_spill] sm:$0xff] %v2025_v12  ;;  %v2490_v42 = vrot.slane %v1349_v28, 4  ;;  %v230_v58 = vsub.f32 %v1369_v34, %v198_v53  ;;  %v208_v63 = vsub.f32 %v1300_v9, %v1506_v20  ;;  %v2043_v59 = vpop.permute.xlu1 %273  ;;  %v2045_v37 = vpop.permute.xlu0 %271  ;;  %v2491_v52 = vrot.slane %v1288_v2, 2 }
  0xef   :  { %2488 = vst [vmem:[#allocation94_spill] sm:$0xff] %v2029_v62  ;;  %2489 = vst [vmem:[#allocation95_spill] sm:$0xff] %v2032_v32  ;;  %v2492_v47 = vrot.slane %v1362_v33, 2  ;;  %v2055_v28 = vmul.f32 %v1362_v33, %v2023_v26  ;;  %v482_v49 = vsub.f32 %v1369_v34, %v1293_v8  ;;  %v296_v20 = vsub.f32 %v1293_v8, %v1460_v54 }
  0xf0   :  { %v755_v41 = vsel %vm373_vm2, %v2490_v42, %v2362_v57  ;;  %v207_v50 = vsub.f32 %v1293_v8, %v1462_v55  ;;  %v2493_v60 = vrot.slane %v1288_v2, 1  ;;  %v2494_v35 = vrot.slane %v1362_v33, 1  ;;  %2496 = vst [vmem:[#allocation97_spill] sm:$0xff] %v2071_v39  ;;  %v2501_v57 = vld [vmem:[#allocation52_spill] sm:$0xff] }
  0xf1   :  { %v295_v45 = vsel %vm283_vm1, %v2492_v47, %v2491_v52  ;;  %v2497_v22 = vrot.slane %v1293_v8, 4  ;;  %v2498_v53 = vrot.slane %v1369_v34, 4  ;;  %v297_v55 = vsub.f32 %v1300_v9, %v1504_v15 }
  0xf2   :  { %v2069_v17 = vsel %vm194_vm0, %v2494_v35, %v2493_v60  ;;  %v793_v42 = vmul.f32 %v789_v21, %v785_v44  ;;  %v331_v52 = vmul.f32 %v327_v27, %v323_v13  ;;  %v2085_v47 = vmul.f32 %v1375_v38, %v1627_v31  ;;  %v2503_v21 = vld [vmem:[#allocation40_spill] sm:$0xff]  ;;  %v2099_v13 = vpop.permute.xlu1 %363  ;;  %v2101_v31 = vpop.permute.xlu0 %361  ;;  %v2511_v38 = vld [vmem:[#allocation23_spill] sm:$0xff] }
  0xf3   :  { %2495 = vst [vmem:[#allocation96_spill] sm:$0xff] %v2069_v17  ;;  %v2079_v54 = vsel %vm373_vm2, %v2498_v53, %v2497_v22  ;;  %v387_v60 = vsub.f32 %v1300_v9, %v1543_v1  ;;  %v584_v35 = vsub.f32 %v1319_v18, %v1612_v30  ;;  %v583_v32 = vsub.f32 %v1322_v19, %v2501_v57  ;;  %v2095_v53 = vld [vmem:[#allocation4 + $0x158] sm:$0xff] }
  0xf4   :  { %2499 = vst [vmem:[#allocation98_spill] sm:$0xff] %v2079_v54  ;;  %2500 = vst [vmem:[#allocation99_spill] sm:$0xff] %v2085_v47  ;;  %v2093_v22 = vand.u32 2147483647, %v230_v58  ;;  %v212_v15 = vand.u32 2147483647, %v208_v63  ;;  %v386_v44 = vsub.f32 %v1293_v8, %v2503_v21  ;;  %v2107_v1 = vmul.f32 %v1362_v33, %v2071_v39 }
  0xf5   :  { %2502 = vst [vmem:[#allocation52_spill] sm:$0xff] %v2095_v53  ;;  %v2103_v27 = vand.u32 2147483647, %v482_v49  ;;  %v300_v30 = vand.u32 2147483647, %v296_v20  ;;  %v2504_v58 = vld [vmem:[#allocation55_spill] sm:$0xff]  ;;  %v2115_v62 = vmul.f32 %v793_v42, %v755_v41  ;;  %v2119_v49 = vmul.f32 %v1362_v33, %v2095_v53 }
  0xf6   :  { %v211_v57 = vand.u32 2147483647, %v207_v50  ;;  %v672_v47 = vsub.f32 %v1319_v18, %v2504_v58  ;;  %v301_v61 = vand.u32 2147483647, %v297_v55  ;;  %v2505_v21 = vld [vmem:[#allocation56_spill] sm:$0xff]  ;;  %v2121_v50 = vmul.f32 %v331_v52, %v295_v45  ;;  %v2509_v58 = vld [vmem:[#allocation62_spill] sm:$0xff]  ;;  %v454_v41 = vpop.permute.xlu1 %453  ;;  %v2128_v42 = vpop.permute.xlu0 %451 }
  0xf7   :  { %v671_v16 = vsub.f32 %v1322_v19, %v2505_v21  ;;  %2506 = vst [vmem:[#allocation40_spill] sm:$0xff] %v2115_v62  ;;  %2507 = vst [vmem:[#allocation55_spill] sm:$0xff] %v2119_v49  ;;  %v391_v39 = vand.u32 2147483647, %v387_v60  ;;  %v588_v12 = vand.u32 2147483647, %v584_v35  ;;  %v760_v3 = vsub.f32 %v1319_v18, %v2509_v58 }
  0xf8   :  { %v587_v20 = vand.u32 2147483647, %v583_v32  ;;  %2508 = vst [vmem:[#allocation56_spill] sm:$0xff] %v2121_v50  ;;  %v390_v25 = vand.u32 2147483647, %v386_v44  ;;  %v2510_v63 = vld [vmem:[#allocation63_spill] sm:$0xff]  ;;  %v220_v21 = vmul.f32 %v2511_v38, %v212_v15 }
  0xf9   :  { %v759_v55 = vsub.f32 %v1322_v19, %v2510_v63  ;;  %v2512_v62 = vld [vmem:[#allocation45_spill] sm:$0xff]  ;;  %v676_v60 = vand.u32 2147483647, %v672_v47  ;;  %v2513_v35 = vld [vmem:[#allocation24_spill] sm:$0xff]  ;;  %v2514_v45 = vld [vmem:[#allocation26_spill] sm:$0xff] }
  0xfa   :  { %v460_v53 = vsub.f32 %v1300_v9, %v2512_v62  ;;  %v219_v32 = vmul.f32 %v2513_v35, %v211_v57  ;;  %v308_v52 = vmul.f32 %v2514_v45, %v300_v30  ;;  %v2515_v44 = vld [vmem:[#allocation46_spill] sm:$0xff]  ;;  %v675_v58 = vand.u32 2147483647, %v671_v16  ;;  %v2516_v63 = vld [vmem:[#allocation25_spill] sm:$0xff]  ;;  %v2517_v15 = vld [vmem:[#allocation27_spill] sm:$0xff]  ;;  %v562_v16 = vpop.permute.xlu1 %561 }
  0xfb   :  { %v459_v50 = vsub.f32 %v1293_v8, %v2515_v44  ;;  %v224_v49 = vmul.f32 %v220_v21, %v1994_v51  ;;  %v309_v26 = vmul.f32 %v2516_v63, %v301_v61  ;;  %v399_v23 = vmul.f32 %v2517_v15, %v391_v39  ;;  %v2518_v17 = vld [vmem:[#allocation31_spill] sm:$0xff]  ;;  %v2519_v9 = vld [vmem:[#allocation32_spill] sm:$0xff]  ;;  %v560_v44 = vpop.permute.xlu0 %559  ;;  %v2522_v63 = vld [vmem:[#allocation34_spill] sm:$0xff] }
  0xfc   :  { %v223_v38 = vmul.f32 %v219_v32, %v1996_v5  ;;  %v596_v54 = vmul.f32 %v2518_v17, %v588_v12  ;;  %v595_v62 = vmul.f32 %v2519_v9, %v587_v20  ;;  %v764_v47 = vand.u32 2147483647, %v760_v3  ;;  %v2520_v35 = vld [vmem:[#allocation67_spill] sm:$0xff]  ;;  %v2521_v45 = vld [vmem:[#allocation28_spill] sm:$0xff]  ;;  %v2525_v20 = vld [vmem:[#allocation33_spill] sm:$0xff] }
  0xfd   :  { %v763_v57 = vand.u32 2147483647, %v759_v55  ;;  %v832_v30 = vsub.f32 %v1319_v18, %v2520_v35  ;;  %v398_v8 = vmul.f32 %v2521_v45, %v390_v25  ;;  %v464_v51 = vand.u32 2147483647, %v460_v53  ;;  %v2523_v32 = vld [vmem:[#allocation68_spill] sm:$0xff]  ;;  %v2526_v15 = vld [vmem:[#allocation65_spill] sm:$0xff] }
  0xfe   :  { %v600_v21 = vmul.f32 %v596_v54, %v562_v16  ;;  %v599_v61 = vmul.f32 %v595_v62, %v560_v44  ;;  %v684_v5 = vmul.f32 %v2522_v63, %v676_v60  ;;  %v831_v39 = vsub.f32 %v1322_v19, %v2523_v32  ;;  %v2524_v12 = vld [vmem:[#allocation64_spill] sm:$0xff]  ;;  %v650_v60 = vpop.permute.xlu1 %649  ;;  %v2527_v45 = vld [vmem:[#allocation35_spill] sm:$0xff] }
  0xff   :  { %v252_v17 = vadd.f32 %v2524_v12, %v224_v49  ;;  %v313_v3 = vmul.f32 %v309_v26, %v2043_v59  ;;  %v683_v55 = vmul.f32 %v2525_v20, %v675_v58  ;;  %v251_v18 = vadd.f32 %v2526_v15, %v223_v38  ;;  %v648_v35 = vpop.permute.xlu0 %647  ;;  %v2528_v44 = vld [vmem:[#allocation36_spill] sm:$0xff]  ;;  %v2529_v38 = vld [vmem:[#allocation66_spill] sm:$0xff] }
 0x100   :  { %v312_v25 = vmul.f32 %v308_v52, %v2045_v37  ;;  %v628_v9 = vadd.f32 %v1833_v40, %v600_v21  ;;  %v627_v54 = vadd.f32 %v1872_v43, %v599_v61  ;;  %v463_v53 = vand.u32 2147483647, %v459_v50  ;;  %v2531_v21 = vld [vmem:[#allocation30_spill] sm:$0xff] }
 0x101   :  { %v836_v62 = vand.u32 2147483647, %v832_v30  ;;  %v772_v16 = vmul.f32 %v2527_v45, %v764_v47  ;;  %v771_v49 = vmul.f32 %v2528_v44, %v763_v57  ;;  %v688_v59 = vmul.f32 %v684_v5, %v650_v60  ;;  %v2530_v57 = vld [vmem:[#allocation29_spill] sm:$0xff]  ;;  %v2538_v45 = vld [vmem:[#allocation74_spill] sm:$0xff]  ;;  %v2539_v44 = vld [vmem:[#allocation72_spill] sm:$0xff] }
 0x102   :  { %v632_v63 = vadd.f32 %v628_v9, %v252_v17  ;;  %v631_v26 = vadd.f32 %v627_v54, %v251_v18  ;;  %v687_v58 = vmul.f32 %v683_v55, %v648_v35  ;;  %v835_v32 = vand.u32 2147483647, %v831_v39  ;;  %v738_v5 = vpop.permute.xlu1 %737  ;;  %v2532_v17 = vld [vmem:[#allocation38_spill] sm:$0xff]  ;;  %v2533_v55 = vld [vmem:[#allocation37_spill] sm:$0xff] }
 0x103   :  { %v342_v12 = vadd.f32 %v2529_v38, %v313_v3  ;;  %v403_v37 = vmul.f32 %v399_v23, %v2099_v13  ;;  %v402_v40 = vmul.f32 %v398_v8, %v2101_v31  ;;  %v341_v43 = vadd.f32 %v1746_v4, %v312_v25  ;;  %v736_v39 = vpop.permute.xlu0 %735  ;;  %v2537_v35 = vld [vmem:[#allocation73_spill] sm:$0xff] }
 0x104   :  { %v716_v50 = vadd.f32 %v1874_v36, %v688_v59  ;;  %v715_v52 = vadd.f32 %v1894_v46, %v687_v58  ;;  %v2163_v47 = vadd.f32 %v632_v63, %v631_v26  ;;  %v472_v30 = vmul.f32 %v2530_v57, %v464_v51  ;;  %v2542_v26 = vld [vmem:[#allocation75_spill] sm:$0xff]  ;;  %v2543_v58 = vld [vmem:[#allocation82_spill] sm:$0xff] }
 0x105   :  { %v471_v61 = vmul.f32 %v2531_v21, %v463_v53  ;;  %v844_v3 = vmul.f32 %v2532_v17, %v836_v62  ;;  %v242_v23 = vmul.f32 %v2055_v28, %v2093_v22  ;;  %v776_v4 = vmul.f32 %v772_v16, %v738_v5  ;;  %v2548_v17 = vld [vmem:[#allocation76_spill] sm:$0xff] }
 0x106   :  { %v720_v13 = vadd.f32 %v716_v50, %v342_v12  ;;  %v719_v31 = vadd.f32 %v715_v52, %v341_v43  ;;  %v775_v8 = vmul.f32 %v771_v49, %v736_v39  ;;  %v432_v36 = vadd.f32 %v1764_v7, %v403_v37  ;;  %v826_v7 = vpop.permute.xlu1 %825  ;;  %v2544_v37 = vld [vmem:[#allocation70_spill] sm:$0xff]  ;;  %v2545_v43 = vld [vmem:[#allocation71_spill] sm:$0xff] }
 0x107   :  { %v431_v46 = vadd.f32 %v1807_v10, %v402_v40  ;;  %v476_v20 = vmul.f32 %v472_v30, %v454_v41  ;;  %v843_v51 = vmul.f32 %v2533_v55, %v835_v32  ;;  %v475_v15 = vmul.f32 %v471_v61, %v2128_v42  ;;  %v824_v54 = vpop.permute.xlu0 %823  ;;  %v2535_v42 = vld [vmem:[#allocation22_spill] sm:$0xff] }
 0x108   :  { %v804_v18 = vadd.f32 %v1913_v6, %v776_v4  ;;  %v803_v25 = vadd.f32 %v1962_v14, %v775_v8  ;;  %v2176_v9 = vadd.f32 %v720_v13, %v719_v31  ;;  %v298_v28 = vsub.f32 %v1343_v24, %v1751_v11  ;;  %v2546_v52 = vld [vmem:[#allocation98_spill] sm:$0xff]  ;;  %v2549_v13 = vld [vmem:[#allocation77_spill] sm:$0xff]  ;;  %v2550_v4 = vld [vmem:[#allocation96_spill] sm:$0xff] }
 0x109   :  { %v209_v22 = vsub.f32 %v1343_v24, %v1753_v48  ;;  %v2184_v10 = vmul.f32 %v2107_v1, %v2103_v27  ;;  %v2534_v41 = vrot.slane %v1322_v19, 2  ;;  %v2536_v6 = vrot.slane %v2535_v42, 2 }
 0x10a   :  { %v808_v53 = vadd.f32 %v804_v18, %v432_v36  ;;  %v807_v62 = vadd.f32 %v803_v25, %v431_v46  ;;  %v848_v60 = vmul.f32 %v844_v3, %v826_v7  ;;  %v847_v11 = vmul.f32 %v843_v51, %v824_v54  ;;  %v276_v50 = vpop.permute.xlu1 %275  ;;  %v2231_v51 = vld [vmem:[#allocation10 + $0x38] sm:$0xff]  ;;  %v2554_v54 = vld [vmem:[#allocation92_spill] sm:$0xff] }
 0x10b   :  { %v662_v14 = vsel %vm283_vm1, %v2536_v6, %v2534_v41  ;;  %v673_v48 = vsub.f32 %v1356_v29, %v2537_v35  ;;  %v585_v16 = vsub.f32 %v1356_v29, %v2538_v45  ;;  %v505_v27 = vadd.f32 %v2539_v44, %v476_v20  ;;  %v2555_v6 = vld [vmem:[#allocation42_spill] sm:$0xff]  ;;  %v2557_v45 = vld [vmem:[#allocation55_spill] sm:$0xff]  ;;  %v2558_v44 = vld [vmem:[#allocation20_spill] sm:$0xff] }
 0x10c   :  { %v2540_v1 = vrot.slane %v1288_v2, 4  ;;  %v2541_v49 = vrot.slane %v1362_v33, 4  ;;  %v504_v59 = vadd.f32 %v2542_v26, %v475_v15  ;;  %v876_v32 = vadd.f32 %v2543_v58, %v848_v60  ;;  %v185_v33 = vpop.permute.xlu0 %184  ;;  %v2553_v15 = vld [vmem:[#allocation87_spill] sm:$0xff] }
 0x10d   :  { %v875_v38 = vadd.f32 %v1999_v0, %v847_v11  ;;  %v2208_v12 = vadd.f32 %v808_v53, %v807_v62  ;;  %v461_v40 = vsub.f32 %v1343_v24, %v2544_v37  ;;  %v388_v2 = vsub.f32 %v1343_v24, %v2545_v43  ;;  %v2556_v53 = vld [vmem:[#allocation39_spill] sm:$0xff]  ;;  %v2563_v37 = vld [vmem:[#allocation48_spill] sm:$0xff] }
 0x10e   :  { %v2203_v63 = vsel %vm373_vm2, %v2541_v49, %v2540_v1  ;;  %v2547_v57 = vsub.f32 %v1369_v34, %v2546_v52  ;;  %v694_v21 = vsub.f32 %v2535_v42, %v662_v14  ;;  %v302_v61 = vand.u32 2147483647, %v298_v28  ;;  %v2560_v1 = vld [vmem:[#allocation21_spill] sm:$0xff]  ;;  %v2564_v43 = vld [vmem:[#allocation44_spill] sm:$0xff]  ;;  %v2565_v52 = vld [vmem:[#allocation43_spill] sm:$0xff] }
 0x10f   :  { %v213_v5 = vand.u32 2147483647, %v209_v22  ;;  %v880_v39 = vadd.f32 %v876_v32, %v505_v27  ;;  %v879_v0 = vadd.f32 %v875_v38, %v504_v59  ;;  %v833_v3 = vsub.f32 %v1356_v29, %v2548_v17  ;;  %v2562_v32 = vld [vmem:[#allocation47_spill] sm:$0xff] }
 0x110   :  { %v413_v30 = vand.u32 2147483647, %v2547_v57  ;;  %v761_v31 = vsub.f32 %v1356_v29, %v2549_v13  ;;  %v2223_v24 = vmul.f32 %v242_v23, %v2550_v4  ;;  %v2551_v8 = vrot.slane %v1322_v19, 1  ;;  %v456_v23 = vpop.permute.xlu1 %455  ;;  %v366_v22 = vpop.permute.xlu0 %365  ;;  %v2568_v4 = vld [vmem:[#allocation51_spill] sm:$0xff] }
 0x111   :  { %v2552_v36 = vrot.slane %v2535_v42, 1  ;;  %v677_v20 = vand.u32 2147483647, %v673_v48  ;;  %v589_v55 = vand.u32 2147483647, %v585_v16  ;;  %v702_v18 = vmul.f32 %v2231_v51, %v2553_v15  ;;  %v2571_v15 = vld [vmem:[#allocation89_spill] sm:$0xff] }
 0x112   :  { %v2235_v25 = vadd.f32 %v880_v39, %v879_v0  ;;  %v465_v29 = vand.u32 2147483647, %v461_v40  ;;  %v392_v28 = vand.u32 2147483647, %v388_v2  ;;  %v698_v7 = vand.u32 2147483647, %v694_v21 }
 0x113   :  { %v574_v46 = vsel %vm194_vm0, %v2552_v36, %v2551_v8  ;;  %v2239_v41 = vmul.f32 %v2231_v51, %v2554_v54  ;;  %v310_v14 = vmul.f32 %v2555_v6, %v302_v61  ;;  %v221_v62 = vmul.f32 %v2556_v53, %v213_v5  ;;  %v2569_v36 = vld [vmem:[#allocation49_spill] sm:$0xff]  ;;  %v2574_v54 = vld [vmem:[#allocation78_spill] sm:$0xff] }
 0x114   :  { %v606_v60 = vsub.f32 %v2535_v42, %v574_v46  ;;  %v854_v11 = vsub.f32 %v2535_v42, %v1322_v19  ;;  %v837_v35 = vand.u32 2147483647, %v833_v3  ;;  %v765_v48 = vand.u32 2147483647, %v761_v31  ;;  %v564_v21 = vpop.permute.xlu0 %563 }
 0x115   :  { %v2247_v16 = vmul.f32 %v2557_v45, %v413_v30  ;;  %v2559_v27 = vrot.slane %v2558_v44, 2  ;;  %v2561_v49 = vrot.slane %v2560_v1, 2  ;;  %v314_v59 = vmul.f32 %v310_v14, %v276_v50  ;;  %v652_v30 = vpop.permute.xlu1 %651  ;;  %v2575_v14 = vld [vmem:[#allocation79_spill] sm:$0xff] }
 0x116   :  { %v225_v58 = vmul.f32 %v221_v62, %v185_v33  ;;  %v685_v38 = vmul.f32 %v2562_v32, %v677_v20  ;;  %v597_v40 = vmul.f32 %v2563_v37, %v589_v55  ;;  %v473_v2 = vmul.f32 %v2564_v43, %v465_v29  ;;  %v2570_v20 = vld [vmem:[#allocation88_spill] sm:$0xff]  ;;  %v2576_v62 = vld [vmem:[#allocation97_spill] sm:$0xff] }
 0x117   :  { %v2255_v26 = vsel %vm283_vm1, %v2561_v49, %v2559_v27  ;;  %v400_v57 = vmul.f32 %v2565_v52, %v392_v28  ;;  %v706_v61 = vmul.f32 %v702_v18, %v698_v7  ;;  %v2566_v5 = vrot.slane %v1322_v19, 4  ;;  %v2572_v19 = vld [vmem:[#allocation93_spill] sm:$0xff]  ;;  %v2573_v28 = vld [vmem:[#allocation94_spill] sm:$0xff]  ;;  %v2577_v49 = vld [vmem:[#allocation83_spill] sm:$0xff] }
 0x118   :  { %v2567_v39 = vrot.slane %v2535_v42, 4  ;;  %v689_v50 = vmul.f32 %v685_v38, %v652_v30  ;;  %v601_v33 = vmul.f32 %v597_v40, %v564_v21  ;;  %v610_v17 = vand.u32 2147483647, %v606_v60  ;;  %v2579_v38 = vld [vmem:[#allocation90_spill] sm:$0xff]  ;;  %v2580_v40 = vld [vmem:[#allocation91_spill] sm:$0xff] }
 0x119   :  { %v858_v3 = vand.u32 2147483647, %v854_v11  ;;  %v477_v13 = vmul.f32 %v473_v2, %v456_v23  ;;  %v404_v31 = vmul.f32 %v400_v57, %v366_v22  ;;  %v845_v8 = vmul.f32 %v2568_v4, %v837_v35  ;;  %v828_v23 = vpop.permute.xlu1 %827  ;;  %v740_v22 = vpop.permute.xlu0 %739  ;;  %v2581_v2 = vld [vmem:[#allocation95_spill] sm:$0xff]  ;;  %v2582_v57 = vld [vmem:[#allocation40_spill] sm:$0xff] }
 0x11a   :  { %v750_v0 = vsel %vm373_vm2, %v2567_v39, %v2566_v5  ;;  %v773_v46 = vmul.f32 %v2569_v36, %v765_v48  ;;  %v343_v55 = vadd.f32 %v2570_v20, %v314_v59  ;;  %v253_v18 = vadd.f32 %v2571_v15, %v225_v58  ;;  %v2578_v58 = vld [vmem:[#allocation84_spill] sm:$0xff]  ;;  %v2586_v15 = vld [vmem:[#allocation85_spill] sm:$0xff] }
 0x11b   :  { %v717_v29 = vadd.f32 %v2572_v19, %v689_v50  ;;  %v629_v7 = vadd.f32 %v2573_v28, %v601_v33  ;;  %v299_v6 = vsub.f32 %v1369_v34, %v2574_v54  ;;  %v210_v53 = vsub.f32 %v1369_v34, %v2575_v14  ;;  %v2583_v39 = vld [vmem:[#allocation80_spill] sm:$0xff]  ;;  %v2584_v50 = vld [vmem:[#allocation81_spill] sm:$0xff] }
 0x11c   :  { %v862_v60 = vmul.f32 %v2231_v51, %v2576_v62  ;;  %v782_v11 = vsub.f32 %v2535_v42, %v750_v0  ;;  %v849_v45 = vmul.f32 %v845_v8, %v828_v23  ;;  %v777_v27 = vmul.f32 %v773_v46, %v740_v22 }
 0x11d   :  { %v721_v35 = vadd.f32 %v717_v29, %v343_v55  ;;  %v633_v48 = vadd.f32 %v629_v7, %v253_v18  ;;  %v674_v59 = vsub.f32 %v2535_v42, %v2577_v49  ;;  %v586_v32 = vsub.f32 %v2535_v42, %v2578_v58  ;;  %v278_v4 = vpop.permute.xlu1 %277  ;;  %v2587_v18 = vld [vmem:[#allocation86_spill] sm:$0xff] }
 0x11e   :  { %v506_v37 = vadd.f32 %v2579_v38, %v477_v13  ;;  %v433_v43 = vadd.f32 %v2580_v40, %v404_v31  ;;  %v877_v52 = vadd.f32 %v2581_v2, %v849_v45  ;;  %v805_v30 = vadd.f32 %v2582_v57, %v777_v27  ;;  %v187_v13 = vpop.permute.xlu0 %186  ;;  %v2585_v31 = vld [vmem:[#allocation52_spill] sm:$0xff]  ;;  %v2591_v45 = vld [vmem:[#allocation57_spill] sm:$0xff]  ;;  %v2592_v49 = vld [vmem:[#allocation58_spill] sm:$0xff] }
 0x11f   :  { %v2289_v21 = vadd.f32 %v2163_v47, %v633_v48  ;;  %v2292_v5 = vadd.f32 %v2176_v9, %v721_v35  ;;  %v462_v0 = vsub.f32 %v1369_v34, %v2583_v39  ;;  %v389_v33 = vsub.f32 %v1369_v34, %v2584_v50  ;;  %v2590_v35 = vld [vmem:[#allocation53_spill] sm:$0xff] }
 0x120   :  { %v786_v8 = vand.u32 2147483647, %v782_v11  ;;  %v790_v36 = vmul.f32 %v2231_v51, %v2585_v31  ;;  %v303_v46 = vand.u32 2147483647, %v299_v6  ;;  %v214_v20 = vand.u32 2147483647, %v210_v53 }
 0x121   :  { %v881_v55 = vadd.f32 %v877_v52, %v506_v37  ;;  %v809_v47 = vadd.f32 %v805_v30, %v433_v43  ;;  %v834_v9 = vsub.f32 %v2535_v42, %v2586_v15  ;;  %v762_v19 = vsub.f32 %v2535_v42, %v2587_v18  ;;  %v458_v62 = vpop.permute.xlu1 %457  ;;  %v2595_v40 = vld [vmem:[#allocation69_spill] sm:$0xff]  ;;  %v2597_v52 = vld [vmem:[#allocation59_spill] sm:$0xff]  ;;  %v2598_v30 = vld [vmem:[#allocation60_spill] sm:$0xff] }
 0x122   :  { %v2588_v29 = vrot.slane %v2558_v44, 1  ;;  %v2589_v34 = vrot.slane %v2560_v1, 1  ;;  %v618_v7 = vmul.f32 %v2239_v41, %v610_v17  ;;  %v678_v54 = vand.u32 2147483647, %v674_v59  ;;  %v368_v11 = vpop.permute.xlu0 %367  ;;  %v2596_v43 = vld [vmem:[#allocation61_spill] sm:$0xff] }
 0x123   :  { %v590_v6 = vand.u32 2147483647, %v586_v32  ;;  %v980_v14 = vadd.f32 %v2208_v12, %v809_v47  ;;  %v1021_v53 = vadd.f32 %v2235_v25, %v881_v55  ;;  %v466_v23 = vand.u32 2147483647, %v462_v0  ;;  %v2600_v55 = vld [vmem:[#allocation56_spill] sm:$0xff] }
 0x124   :  { %v582_v28 = vsel %vm194_vm0, %v2589_v34, %v2588_v29  ;;  %v393_v22 = vand.u32 2147483647, %v389_v33  ;;  %v710_v42 = vmul.f32 %v706_v61, %v2255_v26  ;;  %v770_v48 = vmul.f32 %v2231_v51, %v2590_v35  ;;  %v1115_v33 = vld [vmem:[#allocation10 + $0x20] sm:$0xff]  ;;  %v2601_v35 = vld [vmem:[#allocation41_spill] sm:$0xff] }
 0x125   :  { %v311_v27 = vmul.f32 %v2591_v45, %v303_v46  ;;  %v222_v58 = vmul.f32 %v2592_v49, %v214_v20  ;;  %v866_v41 = vmul.f32 %v862_v60, %v858_v3  ;;  %v794_v17 = vmul.f32 %v790_v36, %v786_v8  ;;  %v1114_v3 = vld [vmem:[#allocation10] sm:$0xff]  ;;  %v2599_v36 = vld [vmem:[#allocation99_spill] sm:$0xff]  ;;  %v2603_v45 = vld [vmem:[#allocation54_spill] sm:$0xff] }
 0x126   :  { %v838_v59 = vand.u32 2147483647, %v834_v9  ;;  %v766_v32 = vand.u32 2147483647, %v762_v19  ;;  %v622_v12 = vmul.f32 %v618_v7, %v582_v28  ;;  %v2593_v25 = vrot.slane %v2558_v44, 4  ;;  %v566_v0 = vpop.permute.xlu0 %565 }
 0x127   :  { %v2594_v38 = vrot.slane %v2560_v1, 4  ;;  %v315_v26 = vmul.f32 %v311_v27, %v278_v4  ;;  %v226_v61 = vmul.f32 %v222_v58, %v187_v13  ;;  %v686_v51 = vmul.f32 %v2595_v40, %v678_v54  ;;  %v654_v1 = vpop.permute.xlu1 %653 }
 0x128   :  { %v598_v2 = vmul.f32 %v2596_v43, %v590_v6  ;;  %v474_v57 = vmul.f32 %v2597_v52, %v466_v23  ;;  %v498_v60 = vmul.f32 %v1114_v3, %v2184_v10  ;;  %v401_v39 = vmul.f32 %v2598_v30, %v393_v22 }
 0x129   :  { %v758_v37 = vsel %vm373_vm2, %v2594_v38, %v2593_v25  ;;  %v425_v44 = vmul.f32 %v2247_v16, %v2203_v63  ;;  %v690_v56 = vmul.f32 %v686_v51, %v654_v1  ;;  %v870_v4 = vmul.f32 %v1115_v33, %v866_v41 }
 0x12a   :  { %v602_v50 = vmul.f32 %v598_v2, %v566_v0  ;;  %v798_v13 = vmul.f32 %v794_v17, %v758_v37  ;;  %v478_v8 = vmul.f32 %v474_v57, %v458_v62  ;;  %v405_v31 = vmul.f32 %v401_v39, %v368_v11  ;;  %v742_v63 = vpop.permute.xlu0 %741 }
 0x12b   :  { %v846_v46 = vmul.f32 %v2599_v36, %v838_v59  ;;  %v774_v20 = vmul.f32 %v770_v48, %v766_v32  ;;  %v344_v47 = vadd.f32 %v2600_v55, %v315_v26  ;;  %v254_v10 = vadd.f32 %v2223_v24, %v226_v61  ;;  %v830_v18 = vpop.permute.xlu1 %829  ;;  %v2602_v48 = vld [vmem:[#allocation50_spill] sm:$0xff] }
 0x12c   :  { %v718_v15 = vadd.f32 %v710_v42, %v690_v56  ;;  %v630_v9 = vadd.f32 %v622_v12, %v602_v50  ;;  %v507_v28 = vadd.f32 %v498_v60, %v478_v8  ;;  %v434_v7 = vadd.f32 %v425_v44, %v405_v31 }
 0x12d   :  { %v850_v16 = vmul.f32 %v846_v46, %v830_v18  ;;  %v778_v19 = vmul.f32 %v774_v20, %v742_v63 }
 0x12e   :  { %v634_v29 = vadd.f32 %v630_v9, %v254_v10  ;;  %v722_v34 = vadd.f32 %v718_v15, %v344_v47 }
 0x12f   :  { %v878_v54 = vadd.f32 %v870_v4, %v850_v16  ;;  %v806_v6 = vadd.f32 %v798_v13, %v778_v19 }
 0x130   :  { %v900_v23 = vadd.f32 %v2289_v21, %v634_v29  ;;  %v940_v22 = vadd.f32 %v2292_v5, %v722_v34 }
 0x131   :  { %v810_v62 = vadd.f32 %v806_v6, %v434_v7  ;;  %v882_v11 = vadd.f32 %v878_v54, %v507_v28 }
 0x132   :  { %901 = vadd.xlane.f32.xlu0 %v900_v23 }
 0x133   :  { %v981_v24 = vadd.f32 %v980_v14, %v810_v62  ;;  %v1022_v42 = vadd.f32 %v1021_v53, %v882_v11 }
 0x135   :  { %982 = vadd.xlane.f32.xlu1 %v981_v24 }
 0x136   :  { %941 = vadd.xlane.f32.xlu0 %v940_v22 }
 0x139   :  { %1023 = vadd.xlane.f32.xlu1 %v1022_v42 }
 0x13a   :  { %964 = vadd.xlane.f32.xlu0 %v2601_v35 }
 0x13e   :  { %1005 = vadd.xlane.f32.xlu0 %v2602_v48 }
 0x142   :  { %1046 = vadd.xlane.f32.xlu0 %v2603_v45 }
 0x161   :  { %v924_v27 = vpop.xlane.xlu1 %923 }
 0x162   :  { %v925_v49 = vrot.slane %v924_v27, 4 }
 0x164   :  { %v926_v58 = vadd.f32 %v925_v49, %v924_v27 }
 0x166   :  { %v927_v21 = vrot.slane %v926_v58, 2 }
 0x168   :  { %v928_v59 = vadd.f32 %v927_v21, %v926_v58 }
 0x16a   :  { %v929_v61 = vrot.slane %v928_v59, 1 }
 0x16c   :  { %v930_v39 = vadd.f32 %v929_v61, %v928_v59 }
 0x1bb   :  { %v902_v41 = vpop.xlane.xlu0 %901 }
 0x1bc   :  { %v903_v5 = vrot.slane %v902_v41, 4 }
 0x1be   :  { %v904_v17 = vadd.f32 %v903_v5, %v902_v41  ;;  %v983_v32 = vpop.xlane.xlu1 %982 }
 0x1bf   :  { %v942_v14 = vpop.xlane.xlu0 %941  ;;  %v984_v12 = vrot.slane %v983_v32, 4 }
 0x1c0   :  { %v905_v53 = vrot.slane %v904_v17, 2  ;;  %v943_v25 = vrot.slane %v942_v14, 4 }
 0x1c1   :  { %v985_v38 = vadd.f32 %v984_v12, %v983_v32 }
 0x1c2   :  { %v944_v37 = vadd.f32 %v943_v25, %v942_v14  ;;  %v906_v26 = vadd.f32 %v905_v53, %v904_v17  ;;  %v1024_v40 = vpop.xlane.xlu1 %1023 }
 0x1c3   :  { %v965_v51 = vpop.xlane.xlu0 %964  ;;  %v986_v43 = vrot.slane %v985_v38, 2  ;;  %v1025_v52 = vrot.slane %v1024_v40, 4 }
 0x1c4   :  { %v945_v2 = vrot.slane %v944_v37, 2  ;;  %v966_v57 = vrot.slane %v965_v51, 4  ;;  %v907_v3 = vrot.slane %v906_v26, 1 }
 0x1c5   :  { %v1026_v60 = vadd.f32 %v1025_v52, %v1024_v40  ;;  %v987_v56 = vadd.f32 %v986_v43, %v985_v38 }
 0x1c6   :  { %v967_v30 = vadd.f32 %v966_v57, %v965_v51  ;;  %v946_v44 = vadd.f32 %v945_v2, %v944_v37  ;;  %v908_v0 = vadd.f32 %v907_v3, %v906_v26 }
 0x1c7   :  { %v1006_v1 = vpop.xlane.xlu0 %1005  ;;  %v1027_v50 = vrot.slane %v1026_v60, 2  ;;  %v988_v55 = vrot.slane %v987_v56, 1 }
 0x1c8   :  { %v968_v33 = vrot.slane %v967_v30, 2  ;;  %v1007_v4 = vrot.slane %v1006_v1, 4  ;;  %v947_v13 = vrot.slane %v946_v44, 1  ;;  %1085 = vpush %v908_v0 }
 0x1c9   :  { %1087 = vpush %v930_v39  ;;  %v1028_v46 = vadd.f32 %v1027_v50, %v1026_v60  ;;  %v989_v16 = vadd.f32 %v988_v55, %v987_v56 }
 0x1ca   :  { %v1008_v8 = vadd.f32 %v1007_v4, %v1006_v1  ;;  %v948_v31 = vadd.f32 %v947_v13, %v946_v44  ;;  %v969_v36 = vadd.f32 %v968_v33, %v967_v30 }
 0x1cb   :  { %v1047_v20 = vpop.xlane.xlu0 %1046  ;;  %v1029_v19 = vrot.slane %v1028_v46, 1 }
 0x1cc   :  { %v1009_v47 = vrot.slane %v1008_v8, 2  ;;  %v1048_v10 = vrot.slane %v1047_v20, 4  ;;  %1089 = vpush %v948_v31  ;;  %v970_v15 = vrot.slane %v969_v36, 1 }
 0x1cd   :  { %v1030_v54 = vadd.f32 %v1029_v19, %v1028_v46 }
 0x1ce   :  { %v1049_v9 = vadd.f32 %v1048_v10, %v1047_v20  ;;  %v971_v18 = vadd.f32 %v970_v15, %v969_v36  ;;  %v1010_v63 = vadd.f32 %v1009_v47, %v1008_v8 }
 0x1d0   :  { %v1050_v29 = vrot.slane %v1049_v9, 2  ;;  %1091 = vpush %v971_v18  ;;  %v1011_v34 = vrot.slane %v1010_v63, 1 }
 0x1d1   :  { %1093 = vpush %v989_v16 }
 0x1d2   :  { %v1051_v28 = vadd.f32 %v1050_v29, %v1049_v9  ;;  %v1012_v7 = vadd.f32 %v1011_v34, %v1010_v63 }
 0x1d4   :  { %1095 = vpush %v1012_v7  ;;  %v1052_v6 = vrot.slane %v1051_v28, 1 }
 0x1d5   :  { %1097 = vpush %v1030_v54 }
 0x1d6   :  { %v1053_v23 = vadd.f32 %v1052_v6, %v1051_v28 }
 0x1d8   :  { %1099 = vpush %v1053_v23 }
 0x1f9   :  { %s1086_s15 = spop %1085 }
 0x1fa   :  { %911 = sst [smem:[#allocation12]] %s1086_s15  ;;  %s1088_s16 = spop %1087 }
 0x1fb   :  { %933 = sst [smem:[#allocation13]] %s1088_s16 }
 0x1fd   :  { %s1090_s17 = spop %1089 }
 0x1fe   :  { %951 = sst [smem:[#allocation12 + $0x1]] %s1090_s17 }
 0x201   :  { %s1092_s18 = spop %1091 }
 0x202   :  { %974 = sst [smem:[#allocation13 + $0x1]] %s1092_s18  ;;  %s1094_s19 = spop %1093 }
 0x203   :  { %992 = sst [smem:[#allocation12 + $0x2]] %s1094_s19 }
 0x205   :  { %s1096_s20 = spop %1095 }
 0x206   :  { %1015 = sst [smem:[#allocation13 + $0x2]] %s1096_s20  ;;  %s1098_s21 = spop %1097 }
 0x207   :  { %1033 = sst [smem:[#allocation12 + $0x3]] %s1098_s21 }
 0x208   :  { %1064 = dma.smem_to_hbm %s1232_s22, 16, %s2349_s4, [#allocation6]  }
 0x209   :  { %s1100_s25 = spop %1099 }
 0x20a   :  { %1056 = sst [smem:[#allocation13 + $0x3]] %s1100_s25 }
 0x20b   :  { %1072 = dma.smem_to_hbm %s1233_s26, 16, %s2350_s5, [#allocation14]  }
 0x20c   :  { %1218 = dma.done.wait [#allocation6], 16  }
 0x20d   :  { %1219 = vsyncadd [#allocation6], 4294967280 }
 0x20e   :  { %1220 = dma.done.wait [#allocation14], 16  }
 0x20f   :  { %1221 = vsyncadd [#allocation14], 4294967280 }
 0x210   :  { %1079 = sfence }
 0x211   :  { %1080 = vsyncpa [#allocation5], 1 }
 0x212   :  { %1081 = vsyncpa [#allocation8], 1 }
 0x213   :  { %1082 = vsyncpa [#allocation11], 1 }
 0x214   :  { %1083 = vsyncpa [#allocation6], 1 }
 0x215   :  { %1084 = vsyncpa [#allocation14], 1 }

</bundles_post_ra>
